<compile_context>
chip_gen: v7x
topology: tpu7x:2x2x1
jax: 0.10.0
libtpu: 0.0.40
codegen_flags: <defaults>
</compile_context>

<pallas_src>
import functools

import jax
import jax.numpy as jnp
from jax.experimental import pallas as pl
from jax.experimental.pallas import tpu as pltpu

LN_EPS = 1e-5  # PyTorch nn.LayerNorm default

# Row layout of the packed parameter slab (8, P), P = max(D, F) rounded to 128.
_ROW_BM, _ROW_G1, _ROW_BE1, _ROW_B1, _ROW_B2, _ROW_G2, _ROW_BE2 = range(7)


def _layernorm(z, gamma, beta):
    # f32 LayerNorm, biased variance (matches torch). Center once, reuse.
    mu = jnp.mean(z, axis=-1, keepdims=True)
    d = z - mu
    var = jnp.mean(d * d, axis=-1, keepdims=True)
    return d * jax.lax.rsqrt(var + LN_EPS) * gamma + beta


def encoder_layer_kernel(
    x_ref,           # (TM, D)  f32 or bf16 token tile
    wm_ref,          # (D, D)   bf16   mamba surrogate linear
    w1_ref,          # (D, F)   bf16   ffn conv1 (k=1) weight
    w2_ref,          # (F, D)   f32    ffn conv2 (k=1) weight (f32 for parity)
    vecs_ref,        # (8, P)   f32    packed biases + LayerNorm affine params
    o_ref,           # (TM, D)
    *, d_model, d_ff,
):
    D, F = d_model, d_ff

    x_in = x_ref[...]
    x = x_in.astype(jnp.float32)          # no-op if tokens already stream in f32
    x_mm = x_in.astype(jnp.bfloat16)      # no-op if tokens already stream in bf16

    # Static row slices out of the single packed parameter slab (one DMA total).
    bm  = vecs_ref[_ROW_BM:_ROW_BM + 1, :D]
    g1  = vecs_ref[_ROW_G1:_ROW_G1 + 1, :D]
    be1 = vecs_ref[_ROW_BE1:_ROW_BE1 + 1, :D]
    b1  = vecs_ref[_ROW_B1:_ROW_B1 + 1, :F]
    b2  = vecs_ref[_ROW_B2:_ROW_B2 + 1, :D]
    g2  = vecs_ref[_ROW_G2:_ROW_G2 + 1, :D]
    be2 = vecs_ref[_ROW_BE2:_ROW_BE2 + 1, :D]

    # --- mamba_forward: externally-injected module; deterministic linear surrogate.
    # TODO(synk): the real Mamba SSM block is injected at construction time in
    # PyTorch and has no definition in this module; a per-token linear stands in.
    h = jnp.dot(x_mm, wm_ref[...], preferred_element_type=jnp.float32) + bm

    # --- addnorm_for: residual=1, drop_flag=0  =>  LayerNorm(x + h)   (f32)
    y1 = _layernorm(x + h, g1, be1)

    # --- ffn: Conv1d(k=1) -> ReLU -> (Dropout = id in eval) -> Conv1d(k=1)
    f = jnp.dot(y1.astype(jnp.bfloat16), w1_ref[...],
                preferred_element_type=jnp.float32) + b1
    f = jnp.maximum(f, 0.0)               # kept f32 (parity; compute is not the bottleneck)
    f2 = jnp.dot(f, w2_ref[...], preferred_element_type=jnp.float32) + b2

    # --- addnorm_ffn: residual=1, drop_flag=1 (eval => dropout identity)   (f32)
    out = _layernorm(y1 + f2, g2, be2)

    o_ref[...] = out.astype(o_ref.dtype)


def _pick_tm(n_rows):
    # Prefer an even number of >=256-row tiles: v7x megacore gets balanced work,
    # v5e/v6e pay one extra ~0.35us step (pass tm=n_rows there if that matters).
    for tm in (512, 256):
        if n_rows % tm == 0 and n_rows // tm >= 2:
            return tm
    # Otherwise the fewest tiles that still divide N (no wrapper pad/slice pass).
    for tm in (1024, 512, 256, 128, 64, 32, 16, 8):
        if n_rows % tm == 0:
            return tm
    return 256  # pathological N: fall back to the padding path below


@functools.partial(jax.jit, static_argnames=("tm",))
def ts_encoder_layer(x, params, *, tm=None):
    B, L, D = x.shape
    F = params["w1"].shape[1]
    P = params["vecs"].shape[1]
    N = B * L
    tm = _pick_tm(N) if tm is None else tm

    xf = x.reshape(N, D)                     # metadata-only (row-major)
    n_pad = (-N) % tm
    if n_pad:
        # Fallback only: costs one extra HBM pass over x and out.  Padded zero
        # rows are safe through LayerNorm (var=0 -> rsqrt(eps)) and sliced off.
        xf = jnp.pad(xf, ((0, n_pad), (0, 0)))
    Np = N + n_pad

    def const_spec(r, c):
        # Grid-invariant operand: constant index map => fetched once; single
        # buffered so the pipeline does not allocate a redundant second copy.
        return pl.BlockSpec((r, c), lambda i: (0, 0),
                            pipeline_mode=pl.Buffered(buffer_count=1))

    kernel = functools.partial(encoder_layer_kernel, d_model=D, d_ff=F)

    out = pl.pallas_call(
        kernel,
        out_shape=jax.ShapeDtypeStruct((Np, D), x.dtype),
        grid_spec=pltpu.PrefetchScalarGridSpec(
            num_scalar_prefetch=0,
            grid=(Np // tm,),
            in_specs=[
                pl.BlockSpec((tm, D), lambda i: (i, 0)),  # token tile
                const_spec(D, D),                         # wm (bf16)
                const_spec(D, F),                         # w1 (bf16)
                const_spec(F, D),                         # w2 (f32)
                const_spec(8, P),                         # packed bias/LN slab (f32)
            ],
            out_specs=pl.BlockSpec((tm, D), lambda i: (i, 0)),
        ),
        compiler_params=pltpu.CompilerParams(
            # Rows are independent => shard grid steps across TensorCores on v7x;
            # measured-neutral on single-TC v5e/v6e.
            dimension_semantics=("parallel",),
        ),
    )(xf, params["wm"], params["w1"], params["w2"], params["vecs"])

    if n_pad:
        out = out[:N]
    return out.reshape(B, L, D)


def _pack_vecs(d_model, d_ff, bm, g1, be1, b1, b2, g2, be2):
    # One (8, P) f32 slab, P = max(D, F) rounded up to a 128-lane multiple.
    P = -(-max(d_model, d_ff) // 128) * 128
    vecs = jnp.zeros((8, P), jnp.float32)
    vecs = vecs.at[_ROW_BM, :d_model].set(bm[0])
    vecs = vecs.at[_ROW_G1, :d_model].set(g1[0])
    vecs = vecs.at[_ROW_BE1, :d_model].set(be1[0])
    vecs = vecs.at[_ROW_B1, :d_ff].set(b1[0])
    vecs = vecs.at[_ROW_B2, :d_model].set(b2[0])
    vecs = vecs.at[_ROW_G2, :d_model].set(g2[0])
    vecs = vecs.at[_ROW_BE2, :d_model].set(be2[0])
    return vecs


def init_params(key, d_model=128, d_ff=256):
    ks = jax.random.split(key, 6)
    s = 0.02
    # NOTE: PyTorch Conv1d(k=1) weights are stored (out_ch, in_ch, 1); this kernel
    # expects (in, out).  A real checkpoint loader MUST do
    #   w_kernel = torch_weight[:, :, 0].T
    # or the results will be silently wrong.
    bm = jax.random.normal(ks[1], (1, d_model), jnp.float32) * s
    g1 = jnp.ones((1, d_model), jnp.float32)
    be1 = jnp.zeros((1, d_model), jnp.float32)
    b1 = jax.random.normal(ks[3], (1, d_ff), jnp.float32) * s
    b2 = jax.random.normal(ks[5], (1, d_model), jnp.float32) * s
    g2 = jnp.ones((1, d_model), jnp.float32)
    be2 = jnp.zeros((1, d_model), jnp.float32)
    params = dict(
        # mamba surrogate linear (d_model -> d_model), bf16 MXU input
        wm=(jax.random.normal(ks[0], (d_model, d_model), jnp.float32) * s
            ).astype(jnp.bfloat16),
        # ffn Conv1d(d_model -> d_ff, k=1): stored (in, out), bf16 MXU input
        w1=(jax.random.normal(ks[2], (d_model, d_ff), jnp.float32) * s
            ).astype(jnp.bfloat16),
        # ffn Conv1d(d_ff -> d_model, k=1): kept f32 (second dot stays f32 for parity)
        w2=jax.random.normal(ks[4], (d_ff, d_model), jnp.float32) * s,
        # individual small params kept for readability / the pure-JAX reference
        bm=bm, g1=g1, be1=be1, b1=b1, b2=b2, g2=g2, be2=be2,
        # packed slab actually consumed by the kernel (single DMA)
        vecs=_pack_vecs(d_model, d_ff, bm, g1, be1, b1, b2, g2, be2),
    )
    return params


def ref_forward(x, params):
    # Pure-JAX f32 reference (same bf16-rounded wm/w1 values, f32 math).
    wm = params["wm"].astype(jnp.float32)
    w1 = params["w1"].astype(jnp.float32)
    w2 = params["w2"]
    h = x @ wm + params["bm"]
    y1 = _layernorm(x + h, params["g1"], params["be1"])
    f = jnp.maximum(y1 @ w1 + params["b1"], 0.0)
    f2 = f @ w2 + params["b2"]
    return _layernorm(y1 + f2, params["g2"], params["be2"])


if __name__ == "__main__":
    # d_model=128, d_ff=256 (module defaults); B*L = 512 => tm auto-picks 256,
    # grid=(2,): one balanced tile per v7x TensorCore, two serial steps on
    # single-TC v5e/v6e, and no wrapper pad/slice pass (512 % 256 == 0).
    B, L, D, F = 2, 256, 128, 256
    key = jax.random.PRNGKey(0)
    kx, kp = jax.random.split(key)
    x = jax.random.normal(kx, (B, L, D), jnp.float32)
    params = init_params(kp, d_model=D, d_ff=F)

    out = ts_encoder_layer(x, params)
    out = jax.block_until_ready(out)

    assert out.shape == (B, L, D)
    assert bool(jnp.all(jnp.isfinite(out)))

    ref = ref_forward(x, params)
    abs_err = float(jnp.max(jnp.abs(out - ref)))
    rel_err = abs_err / (float(jnp.max(jnp.abs(ref))) + 1e-6)
    assert abs_err < 3e-2 and rel_err < 2e-2, (
        f"mismatch vs f32 reference: max abs err = {abs_err}, rel = {rel_err}")

    print("KERNEL_OK")
</pallas_src>

<mosaic_0001>
module attributes {stable_mosaic.version = 11 : i64} {
  func.func @encoder_layer_kernel(%arg0: i32, %arg1: memref<256x128xf32, #tpu.memory_space<vmem>>, %arg2: memref<128x128xbf16, #tpu.memory_space<vmem>>, %arg3: memref<128x256xbf16, #tpu.memory_space<vmem>>, %arg4: memref<256x128xf32, #tpu.memory_space<vmem>>, %arg5: memref<8x256xf32, #tpu.memory_space<vmem>>, %arg6: memref<256x128xf32, #tpu.memory_space<vmem>>) attributes {dimension_semantics = [#tpu.dimension_semantics<parallel>], iteration_bounds = array<i64: 2>, scalar_prefetch = 0 : i64, scratch_operands = 0 : i64, tpu.core_type = #tpu.core_type<tc>, window_params = [{transform_indices = @transform_0, window_bounds = array<i64: 256, 128>}, {pipeline_mode = #tpu.pipeline_mode<synchronous>, transform_indices = @transform_1, window_bounds = array<i64: 128, 128>}, {pipeline_mode = #tpu.pipeline_mode<synchronous>, transform_indices = @transform_2, window_bounds = array<i64: 128, 256>}, {pipeline_mode = #tpu.pipeline_mode<synchronous>, transform_indices = @transform_3, window_bounds = array<i64: 256, 128>}, {pipeline_mode = #tpu.pipeline_mode<synchronous>, transform_indices = @transform_4, window_bounds = array<i64: 8, 256>}, {transform_indices = @transform_5, window_bounds = array<i64: 256, 128>}]} {
    %c0 = arith.constant 0 : index
    %c0_0 = arith.constant 0 : index
    %0 = vector.load %arg1[%c0, %c0_0] : memref<256x128xf32, #tpu.memory_space<vmem>>, vector<256x128xf32>
    %1 = arith.truncf %0 : vector<256x128xf32> to vector<256x128xbf16>
    %c0_1 = arith.constant 0 : index
    %c0_2 = arith.constant 0 : index
    %2 = vector.load %arg5[%c0_1, %c0_2] : memref<8x256xf32, #tpu.memory_space<vmem>>, vector<1x128xf32>
    %c1 = arith.constant 1 : index
    %c0_3 = arith.constant 0 : index
    %3 = vector.load %arg5[%c1, %c0_3] : memref<8x256xf32, #tpu.memory_space<vmem>>, vector<1x128xf32>
    %c2 = arith.constant 2 : index
    %c0_4 = arith.constant 0 : index
    %4 = vector.load %arg5[%c2, %c0_4] : memref<8x256xf32, #tpu.memory_space<vmem>>, vector<1x128xf32>
    %c3 = arith.constant 3 : index
    %c0_5 = arith.constant 0 : index
    %5 = vector.load %arg5[%c3, %c0_5] : memref<8x256xf32, #tpu.memory_space<vmem>>, vector<1x256xf32>
    %c4 = arith.constant 4 : index
    %c0_6 = arith.constant 0 : index
    %6 = vector.load %arg5[%c4, %c0_6] : memref<8x256xf32, #tpu.memory_space<vmem>>, vector<1x128xf32>
    %c5 = arith.constant 5 : index
    %c0_7 = arith.constant 0 : index
    %7 = vector.load %arg5[%c5, %c0_7] : memref<8x256xf32, #tpu.memory_space<vmem>>, vector<1x128xf32>
    %c6 = arith.constant 6 : index
    %c0_8 = arith.constant 0 : index
    %8 = vector.load %arg5[%c6, %c0_8] : memref<8x256xf32, #tpu.memory_space<vmem>>, vector<1x128xf32>
    %c0_9 = arith.constant 0 : index
    %c0_10 = arith.constant 0 : index
    %9 = vector.load %arg2[%c0_9, %c0_10] : memref<128x128xbf16, #tpu.memory_space<vmem>>, vector<128x128xbf16>
    %cst = arith.constant dense<0.000000e+00> : vector<256x128xf32>
    %10 = tpu.matmul %1, %9, %cst {dimension_numbers = #tpu.dot_dimension_numbers<[1], [0], [0], [1], [0, 0, 1, 1], [], []>} : vector<256x128xbf16>, vector<128x128xbf16>, vector<256x128xf32> -> vector<256x128xf32>
    %11 = vector.broadcast %2 : vector<1x128xf32> to vector<256x128xf32>
    %12 = arith.addf %10, %11 : vector<256x128xf32>
    %13 = arith.addf %0, %12 : vector<256x128xf32>
    %cst_11 = arith.constant dense<0.000000e+00> : vector<256xf32>
    %14 = vector.multi_reduction <add>, %13, %cst_11 [1] : vector<256x128xf32> to vector<256xf32>
    %15 = vector.shape_cast %14 : vector<256xf32> to vector<256x1xf32>
    %cst_12 = arith.constant 1.280000e+02 : f32
    %16 = vector.broadcast %cst_12 : f32 to vector<256x1xf32>
    %17 = arith.divf %15, %16 : vector<256x1xf32>
    %18 = vector.broadcast %17 : vector<256x1xf32> to vector<256x128xf32>
    %19 = arith.subf %13, %18 : vector<256x128xf32>
    %20 = arith.mulf %19, %19 : vector<256x128xf32>
    %cst_13 = arith.constant dense<0.000000e+00> : vector<256xf32>
    %21 = vector.multi_reduction <add>, %20, %cst_13 [1] : vector<256x128xf32> to vector<256xf32>
    %22 = vector.shape_cast %21 : vector<256xf32> to vector<256x1xf32>
    %cst_14 = arith.constant 1.280000e+02 : f32
    %23 = vector.broadcast %cst_14 : f32 to vector<256x1xf32>
    %24 = arith.divf %22, %23 : vector<256x1xf32>
    %cst_15 = arith.constant 9.99999974E-6 : f32
    %25 = vector.broadcast %cst_15 : f32 to vector<256x1xf32>
    %26 = arith.addf %24, %25 : vector<256x1xf32>
    %27 = math.rsqrt %26 : vector<256x1xf32>
    %28 = vector.broadcast %27 : vector<256x1xf32> to vector<256x128xf32>
    %29 = arith.mulf %19, %28 : vector<256x128xf32>
    %30 = vector.broadcast %3 : vector<1x128xf32> to vector<256x128xf32>
    %31 = arith.mulf %29, %30 : vector<256x128xf32>
    %32 = vector.broadcast %4 : vector<1x128xf32> to vector<256x128xf32>
    %33 = arith.addf %31, %32 : vector<256x128xf32>
    %34 = arith.truncf %33 : vector<256x128xf32> to vector<256x128xbf16>
    %c0_16 = arith.constant 0 : index
    %c0_17 = arith.constant 0 : index
    %35 = vector.load %arg3[%c0_16, %c0_17] : memref<128x256xbf16, #tpu.memory_space<vmem>>, vector<128x256xbf16>
    %cst_18 = arith.constant dense<0.000000e+00> : vector<256x256xf32>
    %36 = tpu.matmul %34, %35, %cst_18 {dimension_numbers = #tpu.dot_dimension_numbers<[1], [0], [0], [1], [0, 0, 1, 1], [], []>} : vector<256x128xbf16>, vector<128x256xbf16>, vector<256x256xf32> -> vector<256x256xf32>
    %37 = vector.broadcast %5 : vector<1x256xf32> to vector<256x256xf32>
    %38 = arith.addf %36, %37 : vector<256x256xf32>
    %cst_19 = arith.constant 0.000000e+00 : f32
    %39 = vector.broadcast %cst_19 : f32 to vector<256x256xf32>
    %40 = arith.maximumf %38, %39 : vector<256x256xf32>
    %c0_20 = arith.constant 0 : index
    %c0_21 = arith.constant 0 : index
    %41 = vector.load %arg4[%c0_20, %c0_21] : memref<256x128xf32, #tpu.memory_space<vmem>>, vector<256x128xf32>
    %cst_22 = arith.constant dense<0.000000e+00> : vector<256x128xf32>
    %42 = tpu.matmul %40, %41, %cst_22 {dimension_numbers = #tpu.dot_dimension_numbers<[1], [0], [0], [1], [0, 0, 1, 1], [], []>} : vector<256x256xf32>, vector<256x128xf32>, vector<256x128xf32> -> vector<256x128xf32>
    %43 = vector.broadcast %6 : vector<1x128xf32> to vector<256x128xf32>
    %44 = arith.addf %42, %43 : vector<256x128xf32>
    %45 = arith.addf %33, %44 : vector<256x128xf32>
    %cst_23 = arith.constant dense<0.000000e+00> : vector<256xf32>
    %46 = vector.multi_reduction <add>, %45, %cst_23 [1] : vector<256x128xf32> to vector<256xf32>
    %47 = vector.shape_cast %46 : vector<256xf32> to vector<256x1xf32>
    %cst_24 = arith.constant 1.280000e+02 : f32
    %48 = vector.broadcast %cst_24 : f32 to vector<256x1xf32>
    %49 = arith.divf %47, %48 : vector<256x1xf32>
    %50 = vector.broadcast %49 : vector<256x1xf32> to vector<256x128xf32>
    %51 = arith.subf %45, %50 : vector<256x128xf32>
    %52 = arith.mulf %51, %51 : vector<256x128xf32>
    %cst_25 = arith.constant dense<0.000000e+00> : vector<256xf32>
    %53 = vector.multi_reduction <add>, %52, %cst_25 [1] : vector<256x128xf32> to vector<256xf32>
    %54 = vector.shape_cast %53 : vector<256xf32> to vector<256x1xf32>
    %cst_26 = arith.constant 1.280000e+02 : f32
    %55 = vector.broadcast %cst_26 : f32 to vector<256x1xf32>
    %56 = arith.divf %54, %55 : vector<256x1xf32>
    %cst_27 = arith.constant 9.99999974E-6 : f32
    %57 = vector.broadcast %cst_27 : f32 to vector<256x1xf32>
    %58 = arith.addf %56, %57 : vector<256x1xf32>
    %59 = math.rsqrt %58 : vector<256x1xf32>
    %60 = vector.broadcast %59 : vector<256x1xf32> to vector<256x128xf32>
    %61 = arith.mulf %51, %60 : vector<256x128xf32>
    %62 = vector.broadcast %7 : vector<1x128xf32> to vector<256x128xf32>
    %63 = arith.mulf %61, %62 : vector<256x128xf32>
    %64 = vector.broadcast %8 : vector<1x128xf32> to vector<256x128xf32>
    %65 = arith.addf %63, %64 : vector<256x128xf32>
    %c0_28 = arith.constant 0 : index
    %c0_29 = arith.constant 0 : index
    %66 = vector.load %arg6[%c0_28, %c0_29] : memref<256x128xf32, #tpu.memory_space<vmem>>, vector<256x128xf32>
    tpu.vector_store %arg6[%c0_28, %c0_29], %65 {strides = array<i32>} : memref<256x128xf32, #tpu.memory_space<vmem>>, vector<256x128xf32>,
    return
  }
  func.func @transform_0(%arg0: i32) -> (i32, i32) {
    %c0_i32 = arith.constant 0 : i32
    %c0_i32_0 = arith.constant 0 : i32
    return %arg0, %c0_i32 : i32, i32
  }
  func.func @transform_1(%arg0: i32) -> (i32, i32) {
    %c0_i32 = arith.constant 0 : i32
    %c0_i32_0 = arith.constant 0 : i32
    %c0_i32_1 = arith.constant 0 : i32
    return %c0_i32, %c0_i32_0 : i32, i32
  }
  func.func @transform_2(%arg0: i32) -> (i32, i32) {
    %c0_i32 = arith.constant 0 : i32
    %c0_i32_0 = arith.constant 0 : i32
    %c0_i32_1 = arith.constant 0 : i32
    return %c0_i32, %c0_i32_0 : i32, i32
  }
  func.func @transform_3(%arg0: i32) -> (i32, i32) {
    %c0_i32 = arith.constant 0 : i32
    %c0_i32_0 = arith.constant 0 : i32
    %c0_i32_1 = arith.constant 0 : i32
    return %c0_i32, %c0_i32_0 : i32, i32
  }
  func.func @transform_4(%arg0: i32) -> (i32, i32) {
    %c0_i32 = arith.constant 0 : i32
    %c0_i32_0 = arith.constant 0 : i32
    %c0_i32_1 = arith.constant 0 : i32
    return %c0_i32, %c0_i32_0 : i32, i32
  }
  func.func @transform_5(%arg0: i32) -> (i32, i32) {
    %c0_i32 = arith.constant 0 : i32
    %c0_i32_0 = arith.constant 0 : i32
    return %arg0, %c0_i32 : i32, i32
  }
}

</mosaic_0001>

<bundles_post_ra>
// kernel: ts_encoder_layer.1
= control target key start
LH: loop header
LB: loop body
LE: loop exit
PB: predicated region body
PF: predicated region fallthrough
CT: control target
= control target key end

     0   :  { %10 = vsyncpa [#allocation3], 0  ;;  %s4506_s0 = inlined_call_operand.hbm [shape: f32[512,128], index: 0, kind: input, shape index: {}]   ;;  %s4507_s1 = inlined_call_operand.hbm [shape: bf16[128,128], index: 1, kind: input, shape index: {}]   ;;  %s4508_s2 = inlined_call_operand.hbm [shape: bf16[128,256], index: 2, kind: input, shape index: {}]   ;;  %s4509_s3 = inlined_call_operand.hbm [shape: f32[256,128], index: 3, kind: input, shape index: {}]   ;;  %s4510_s4 = inlined_call_operand.hbm [shape: f32[8,256], index: 4, kind: input, shape index: {}]   ;;  %s4511_s5 = inlined_call_operand.hbm [shape: f32[512,128], index: 5, kind: output, shape index: {}]  }
   0x1   :  { %12 = vsyncpa [#allocation3 + $0x1], 0 }
   0x2   :  { %13 = vsyncpa [#allocation6], 0 }
   0x3   :  { %14 = vsyncpa [#allocation9], 0 }
   0x4   :  { %15 = vsyncpa [#allocation4], 0 }
   0x5   :  { %17 = vsyncpa [#allocation4 + $0x1], 0  ;;  %s2991_s18 = smov 0   ;;  %s2993_s19 = smov 0  }
   0x6   :  { %s2995_s20 = smov 0   ;;  %s2997_s21 = smov 0  }
   0x7 LB: > { %s3012_s22 = sadd.s32 4294967295, %s2945_s21   ;;  %s2274_s23 = sadd.s32 4294967294, %s2945_s21   ;;  %s2945_s21 = sphi %s2997_s21, %s4534_s21   ;;  %s2941_s20 = sphi %s2995_s20, %s4533_s20   ;;  %s2937_s19 = sphi %s2993_s19, %s4532_s19   ;;  %s2933_s18 = sphi %s2991_s18, %s4531_s18  }
   0x8   : > { %p43_p0 = scmp.ne.s32.totalorder %s2937_s19, %s2933_s18  ;;  %p4512_p1 = scmp.eq.s32.totalorder %s3012_s22, 0 }
   0x9   : > { %p157_p3 = scmp.eq.s32.totalorder %s2274_s23, 1  ;;  %p2275_p5 = scmp.ge.s32.totalorder %s2945_s21, 1 }
   0xa   : > { %p3021_p4 = por %p4512_p1, %p43_p0  ;;  %p164_p7 = scmp.lt.s32.totalorder %s2945_s21, 3 }
   0xb   : > { %p3026_p6 = por %p157_p3, %p43_p0  ;;  %s2947_s27 = smov [#allocation5]  }
   0xc   : > { %s4515_s24 = scalar_select %p3021_p4, 1, 0 }
   0xd   : > { %s4516_s25 = scalar_select %p3026_p6, 1, 0 }
   0xe   : > { %p3031_p8 = pnand %p2275_p5, %p164_p7  ;;  %s176_s28 = sshll.u32 %s2947_s27, 4  ;;  %s177_s28 = int_to_ptr.vmem [resolvable:$true] %s176_s28 }
   0xf   : > { %s2948_s30 = smov [#allocation8]   ;;  %s2729_s9 = scalar_lea.hbm %s4507_s1, 1024 }
  0x10   : > { %s4517_s26 = scalar_select %p3031_p8, 1, 0 }
  0x11   : > { %p2494_p9 = pneg %p3031_p8  ;;  %s202_s6 = sshll.u32 %s2948_s30, 4  ;;  %s203_s6 = int_to_ptr.vmem [resolvable:$true] %s202_s6 }
  0x12   : > { %p2730_p12 = scmp.ne.s32.totalorder %s4507_s1, %s2729_s9  ;;  %p2736_p5 = scmp.lt.u32.totalorder %s2729_s9, %s4507_s1 }
  0x13   : > { %p3040_p11 = pnand %p2494_p9, %p4512_p1 }
  0x15   : > { %p3052_p13 = pneg %p3040_p11 }
  0x17   : > { %p2732_p0 = pnand %p3052_p13, %p2730_p12 }
  0x19   : > { %p2733_p3 = pneg %p2732_p0 }
  0x1b   : > { %p2738_p7 = pnand %p2736_p5, %p2733_p3 }
  0x1d   : > { %2741 = shalt.err (!%p2738_p7)
}
  0x1e   : > { %s2742_s15 = scalar_lea.vmem %s177_s28, 1024  ;;  %p2750_p2 = scmp.lt.s32.totalorder %s177_s28, %s177_s28 }
  0x1f   : > { %p2743_p9 = scmp.ne.s32.totalorder %s177_s28, %s2742_s15  ;;  %p2751_p6 = scmp.lt.s32.totalorder %s2742_s15, %s2742_s15 }
  0x21   : > { %p2745_p10 = pnand %p2743_p9, %p3052_p13  ;;  %p2752_p4 = por %p2751_p6, %p2750_p2 }
  0x23   : > { %p2746_p1 = pneg %p2745_p10 }
  0x25   : > { %p2753_p8 = pnand %p2752_p4, %p2746_p1 }
  0x27   : > { %2756 = shalt.err (!%p2753_p8)
}
  0x28   : > { %s2949_s16 = smov 64   ;;  %s2950_s17 = smov 4  }
  0x29   : > { %2497 = dma.hbm_to_vmem [thread:$0]  (!%p3040_p11), %s4507_s1, 1024, %s177_s28, [#allocation6], %s2949_s16, %s2949_s16, %s2950_s17  }
  0x2a   : > { %s2951_s30 = smov [#allocation7]   ;;  %s2757_s10 = scalar_lea.hbm %s4509_s3, 4096 }
  0x2b   : > { %s189_s7 = sshll.u32 %s2951_s30, 4  ;;  %p2758_p1 = scmp.ne.s32.totalorder %s4509_s3, %s2757_s10  ;;  %s190_s7 = int_to_ptr.vmem [resolvable:$true] %s189_s7 }
  0x2c   : > { %p2764_p6 = scmp.lt.u32.totalorder %s2757_s10, %s4509_s3 }
  0x2d   : > { %p2760_p2 = pnand %p2758_p1, %p3052_p13 }
  0x2f   : > { %p2761_p4 = pneg %p2760_p2 }
  0x31   : > { %p2766_p8 = pnand %p2764_p6, %p2761_p4 }
  0x33   : > { %2769 = shalt.err (!%p2766_p8)
}
  0x34   : > { %s2770_s28 = scalar_lea.vmem %s203_s6, 4096  ;;  %p2778_p3 = scmp.lt.s32.totalorder %s203_s6, %s203_s6 }
  0x35   : > { %p2771_p10 = scmp.ne.s32.totalorder %s203_s6, %s2770_s28  ;;  %p2779_p5 = scmp.lt.s32.totalorder %s2770_s28, %s2770_s28 }
  0x37   : > { %p2773_p12 = pnand %p2771_p10, %p3052_p13  ;;  %p2780_p7 = por %p2779_p5, %p2778_p3 }
  0x39   : > { %p2774_p0 = pneg %p2773_p12 }
  0x3b   : > { %p2781_p9 = pnand %p2780_p7, %p2774_p0 }
  0x3d   : > { %2784 = shalt.err (!%p2781_p9)
}
  0x3e   : > { %s2952_s16 = smov 128   ;;  %s2953_s17 = smov 8  }
  0x3f   : > { %2503 = dma.hbm_to_vmem [thread:$0]  (!%p3040_p11), %s4509_s3, 4096, %s203_s6, [#allocation9], %s2952_s16, %s2952_s16, %s2953_s17  }
  0x40   : > { %s2785_s9 = scalar_lea.hbm %s4508_s2, 2048 }
  0x41   : > { %p2786_p1 = scmp.ne.s32.totalorder %s4508_s2, %s2785_s9  ;;  %p2792_p6 = scmp.lt.u32.totalorder %s2785_s9, %s4508_s2 }
  0x43   : > { %p2788_p2 = pnand %p2786_p1, %p3052_p13 }
  0x45   : > { %p2789_p4 = pneg %p2788_p2 }
  0x47   : > { %p2794_p8 = pnand %p2792_p6, %p2789_p4 }
  0x49   : > { %2797 = shalt.err (!%p2794_p8)
}
  0x4a   : > { %s2798_s15 = scalar_lea.vmem %s190_s7, 2048  ;;  %p2806_p3 = scmp.lt.s32.totalorder %s190_s7, %s190_s7 }
  0x4b   : > { %p2799_p10 = scmp.ne.s32.totalorder %s190_s7, %s2798_s15  ;;  %p2807_p5 = scmp.lt.s32.totalorder %s2798_s15, %s2798_s15 }
  0x4d   : > { %p2801_p12 = pnand %p2799_p10, %p3052_p13  ;;  %p2808_p7 = por %p2807_p5, %p2806_p3 }
  0x4f   : > { %p2802_p0 = pneg %p2801_p12 }
  0x51   : > { %p2809_p9 = pnand %p2808_p7, %p2802_p0 }
  0x53   : > { %2812 = shalt.err (!%p2809_p9)
}
  0x54   : > { %2500 = dma.hbm_to_vmem [thread:$0]  (!%p3040_p11), %s4508_s2, 2048, %s190_s7, [#allocation6], %s2952_s16, %s2952_s16, %s2953_s17  }
  0x55   : > { %s2954_s23 = smov [#allocation10]   ;;  %s2813_s9 = scalar_lea.hbm %s4510_s4, 256 }
  0x56   : > { %s216_s27 = sshll.u32 %s2954_s23, 4  ;;  %p2814_p1 = scmp.ne.s32.totalorder %s4510_s4, %s2813_s9  ;;  %s217_s27 = int_to_ptr.vmem [resolvable:$true] %s216_s27 }
  0x57   : > { %p2820_p6 = scmp.lt.u32.totalorder %s2813_s9, %s4510_s4 }
  0x58   : > { %p2816_p2 = pnand %p2814_p1, %p3052_p13 }
  0x5a   : > { %p2817_p4 = pneg %p2816_p2 }
  0x5c   : > { %p2822_p8 = pnand %p2820_p6, %p2817_p4 }
  0x5e   : > { %2825 = shalt.err (!%p2822_p8)
}
  0x5f   : > { %s2826_s7 = scalar_lea.vmem %s217_s27, 256  ;;  %p2834_p3 = scmp.lt.s32.totalorder %s217_s27, %s217_s27 }
  0x60   : > { %p2827_p10 = scmp.ne.s32.totalorder %s217_s27, %s2826_s7  ;;  %p2835_p5 = scmp.lt.s32.totalorder %s2826_s7, %s2826_s7 }
  0x62   : > { %p2829_p12 = pnand %p2827_p10, %p3052_p13  ;;  %p2836_p7 = por %p2835_p5, %p2834_p3 }
  0x64   : > { %p2830_p0 = pneg %p2829_p12 }
  0x66   : > { %p2837_p9 = pnand %p2836_p7, %p2830_p0 }
  0x68   : > { %2840 = shalt.err (!%p2837_p9)
}
  0x69   : > { %2506 = dma.hbm_to_vmem [thread:$0]  (!%p3040_p11), %s4510_s4, 256, %s217_s27, [#allocation9]  }
  0x6a   : > { %s3129_s12 = sadd.s32 1, %s2945_s21   ;;  %s30_s28 = sadd.s32 1, %s2941_s20 }
  0x6b   : > { %s27_s29 = ssub.s32 %s2945_s21, %s3129_s12  ;;  %p37_p13 = scmp.ne.s32.totalorder %s2941_s20, %s2937_s19 }
  0x6c   : > { %p28_p1 = scmp.eq.s32.totalorder %s27_s29, 0  ;;  %p38_p2 = scmp.eq.s32.totalorder %s2945_s21, 0 }
  0x6d   : > { %p4520_p4 = scmp.eq.s32.totalorder %s3012_s22, 1  ;;  %p2519_p8 = scmp.lt.s32.totalorder %s2945_s21, 2 }
  0x6e   : > { %s3145_s30 = scalar_select %p28_p1, %s2941_s20, %s30_s28  }
  0x6f   : > { %p3139_p6 = por %p4520_p4, %p37_p13  ;;  %p39_p10 = por %p38_p2, %p37_p13 }
  0x70   : > { %s227_s8 = sand.u32 1, %s2941_s20   ;;  %s2320_s27 = sshll.u32 %s2945_s21, 12 }
  0x71   : > { %s2281_s9 = sshll.u32 %s227_s8, 8  ;;  %s3152_s13 = scalar_lea.hbm %s4506_s0, %s2320_s27 }
  0x72   : > { %s231_s14 = scalar_lea.vmem [#allocation2], %s2281_s9  ;;  %p3156_p11 = pnand %p2519_p8, %p39_p10 }
  0x73   : > { %s238_s7 = sshll.u32 %s231_s14, 4  ;;  %s3160_s6 = scalar_lea.sflag [#allocation3], %s227_s8  ;;  %s3154_s7 = int_to_ptr.vmem [resolvable:$true] %s238_s7 }
  0x74   : > { %s2841_s28 = scalar_lea.hbm %s3152_s13, 4096  ;;  %p2843_p0 = pneg %p3156_p11 }
  0x75   : > { %p2842_p12 = scmp.ne.s32.totalorder %s3152_s13, %s2841_s28  ;;  %s2846_s27 = scalar_lea.hbm %s4506_s0, 8192 }
  0x76   : > { %p2847_p7 = scmp.lt.u32.totalorder %s3152_s13, %s4506_s0  ;;  %p2848_p9 = scmp.lt.u32.totalorder %s2846_s27, %s2841_s28 }
  0x77   : > { %p2844_p3 = pnand %p2843_p0, %p2842_p12  ;;  %p2850_p1 = scmp.lt.u32.totalorder %s2841_s28, %s3152_s13 }
  0x78   : > { %p2849_p13 = por %p2848_p9, %p2847_p7 }
  0x79   : > { %p2845_p5 = pneg %p2844_p3 }
  0x7a   : > { %p2851_p2 = por %p2850_p1, %p2849_p13 }
  0x7c   : > { %p2852_p4 = pnand %p2851_p2, %p2845_p5 }
  0x7e   : > { %2855 = shalt.err (!%p2852_p4)
}
  0x7f   : > { %s2856_s8 = scalar_lea.vmem %s3154_s7, 4096  ;;  %s2955_s14 = smov [#allocation2]  }
  0x80   : > { %p2857_p8 = scmp.ne.s32.totalorder %s3154_s7, %s2856_s8  ;;  %s2861_s29 = sshll.u32 %s2955_s14, 4  ;;  %s2862_s29 = int_to_ptr.vmem [resolvable:$false] %s2861_s29 }
  0x81   : > { %s2863_s9 = scalar_lea.vmem %s2862_s29, 8192  ;;  %p2864_p3 = scmp.lt.s32.totalorder %s3154_s7, %s2862_s29 }
  0x82   : > { %p2859_p10 = pnand %p2857_p8, %p2843_p0  ;;  %p2865_p7 = scmp.lt.s32.totalorder %s2863_s9, %s2856_s8 }
  0x84   : > { %p2860_p12 = pneg %p2859_p10  ;;  %p2866_p9 = por %p2865_p7, %p2864_p3 }
  0x86   : > { %p2867_p13 = pnand %p2866_p9, %p2860_p12 }
  0x88   : > { %2870 = shalt.err (!%p2867_p13)
}
  0x89   : > { %2510 = dma.hbm_to_vmem [thread:$0]  (!%p3156_p11), %s3152_s13, 4096, %s3154_s7, %s3160_s6, %s2952_s16, %s2952_s16, %s2953_s17  }
  0x8a   : > { %p4523_p0 = scmp.ne.s32.totalorder %s4517_s26, 0 }
  0x8b   : > { %s3194_s28 = sand.u32 (!%p4523_p0), 1, %s2937_s19   ;;  %p4524_p5 = scmp.ne.s32.totalorder (!%p4523_p0), %s4515_s24, 0 }
  0x8c   : > { %250 = sbr.rel (%p4523_p0) target bundleno = 1678 (0x68e), region = 40  ;;  %s2285_s27 = sshll.u32 (!%p4523_p0), %s3194_s28, 8 }
  0x8d   : > { %s253_s10 = scalar_lea.sflag (!%p4523_p0), [#allocation3], %s3194_s28  ;;  %s3200_s15 = scalar_lea.vmem (!%p4523_p0), [#allocation2], %s2285_s27 }
  0x93   : > { %2916 = dma.done.wait (%p4524_p5), %s253_s10, 4096  }
  0x94   : > { %2918 = vsyncadd (%p4524_p5), %s253_s10, 4294963200  ;;  %p4525_p11 = scmp.eq.s32.totalorder %s3012_s22, 0 }
  0x96   : > { %2920 = dma.done.wait (%p4525_p11), [#allocation6], 3072   ;;  %p4526_p1 = pmov %p4525_p11 }
  0x98   : > { %2922 = vsyncadd (%p4526_p1), [#allocation6], 4294964224  ;;  %p4527_p2 = pmov %p4526_p1 }
  0x99   : > { %p4528_p4 = pmov %p4526_p1 }
  0x9a   : > { %2924 = dma.done.wait (%p4527_p2), [#allocation9], 4352  }
  0x9b   : > { %2926 = vsyncadd (%p4528_p4), [#allocation9], 4294962944  ;;  %v2569_v0 = vld [vmem:[#allocation5] sm:$0xff]   ;;  %v2570_v1 = vld [vmem:[#allocation5 + $0x8] sm:$0xff]   ;;  %s4330_s24 = scalar_lea.vmem [#allocation11], %s2285_s27  ;;  %s2321_s26 = sshll.u32 %s3012_s22, 12 }
  0x9c   : > { %2346 = vmatprep.subr.bf16.mxu0 %v2569_v0  ;;  %v2571_v2 = vld [vmem:[#allocation5 + $0x10] sm:$0xff]   ;;  %v2572_v3 = vld [vmem:[#allocation5 + $0x18] sm:$0xff]   ;;  %v3215_v4 = vld [vmem:[%s3200_s15] sm:$0xff]  ;;  %s2163_s16 = sshll.u32 %s4330_s24, 4  ;;  %s4458_s7 = scalar_lea.hbm %s4511_s5, %s2321_s26  ;;  %s4460_s16 = int_to_ptr.vmem [resolvable:$true] %s2163_s16 }
  0x9d   : > { %2347 = vmatpush3.bf16.msra.mxu0 %v2569_v0  ;;  %v3218_v5 = vld [vmem:[%s3200_s15 + $0x8] sm:$0xff]  ;;  %v2573_v7 = vld [vmem:[#allocation5 + $0x20] sm:$0xff]   ;;  %v2575_v9 = vld [vmem:[#allocation5 + $0x30] sm:$0xff]   ;;  %s2150_s6 = scalar_lea.sflag [#allocation4], %s3194_s28  ;;  %s2871_s11 = scalar_lea.vmem %s4460_s16, 4096 }
  0x9e   : > { %2348 = vmatprep.subr.bf16.mxu0 %v2570_v1  ;;  %v334_v6 = vpack.c.bf16 %v3218_v5, %v3215_v4  ;;  %v2574_v8 = vld [vmem:[#allocation5 + $0x28] sm:$0xff]   ;;  %v2576_v10 = vld [vmem:[#allocation5 + $0x38] sm:$0xff]   ;;  %v3223_v11 = vld [vmem:[%s3200_s15 + $0x10] sm:$0xff]  ;;  %p2872_p8 = scmp.ne.s32.totalorder %s4460_s16, %s2871_s11  ;;  %s2958_s22 = smov [#allocation11]  }
  0x9f   : > { %v3226_v12 = vld [vmem:[%s3200_s15 + $0x18] sm:$0xff]  ;;  %v3229_v13 = vld [vmem:[%s3200_s15 + $0x20] sm:$0xff]  ;;  %v3232_v14 = vld [vmem:[%s3200_s15 + $0x28] sm:$0xff]  ;;  %s2875_s8 = sshll.u32 %s2958_s22, 4  ;;  %s2876_s8 = int_to_ptr.vmem [resolvable:$false] %s2875_s8 }
  0xa0   : > { %2362 = vmatprep.mubr.bf16.mxu0 %v334_v6  ;;  %v335_v15 = vpack.c.bf16 %v3226_v12, %v3223_v11  ;;  %v336_v16 = vpack.c.bf16 %v3232_v14, %v3229_v13  ;;  %v3239_v17 = vld [vmem:[%s3200_s15 + $0x30] sm:$0xff]  ;;  %v3242_v18 = vld [vmem:[%s3200_s15 + $0x38] sm:$0xff]  ;;  %v3245_v19 = vld [vmem:[%s3200_s15 + $0x40] sm:$0xff]  ;;  %p2873_p10 = pnand %p2872_p8, %p3139_p6  ;;  %s2877_s14 = scalar_lea.vmem %s2876_s8, 8192 }
  0xa1   : > { %2349 = vmatpush3.bf16.msra.mxu0 %v2570_v1  ;;  %v3248_v20 = vld [vmem:[%s3200_s15 + $0x48] sm:$0xff]  ;;  %v337_v21 = vpack.c.bf16 %v3242_v18, %v3239_v17  ;;  %v3255_v23 = vld [vmem:[%s3200_s15 + $0x50] sm:$0xff]  ;;  %v3258_v24 = vld [vmem:[%s3200_s15 + $0x58] sm:$0xff]  ;;  %p2878_p3 = scmp.lt.s32.totalorder %s4460_s16, %s2876_s8  ;;  %p2879_p7 = scmp.lt.s32.totalorder %s2877_s14, %s2871_s11 }
  0xa2   : > { %2350 = vmatprep.subr.bf16.mxu0 %v2571_v2  ;;  %v338_v22 = vpack.c.bf16 %v3248_v20, %v3245_v19  ;;  %v3261_v25 = vld [vmem:[%s3200_s15 + $0x60] sm:$0xff]  ;;  %v3264_v26 = vld [vmem:[%s3200_s15 + $0x68] sm:$0xff]  ;;  %v339_v27 = vpack.c.bf16 %v3258_v24, %v3255_v23  ;;  %v3271_v29 = vld [vmem:[%s3200_s15 + $0x70] sm:$0xff]  ;;  %p2874_p12 = pneg %p2873_p10 }
  0xa3   : > { %v340_v28 = vpack.c.bf16 %v3264_v26, %v3261_v25  ;;  %v3274_v30 = vld [vmem:[%s3200_s15 + $0x78] sm:$0xff]  ;;  %v3277_v31 = vld [vmem:[%s3200_s15 + $0x80] sm:$0xff]  ;;  %v3280_v32 = vld [vmem:[%s3200_s15 + $0x88] sm:$0xff]  ;;  %p2880_p9 = por %p2879_p7, %p2878_p3 }
  0xa4   : > { %v341_v33 = vpack.c.bf16 %v3274_v30, %v3271_v29  ;;  %v342_v34 = vpack.c.bf16 %v3280_v32, %v3277_v31  ;;  %v3287_v35 = vld [vmem:[%s3200_s15 + $0x90] sm:$0xff]  ;;  %v3290_v36 = vld [vmem:[%s3200_s15 + $0x98] sm:$0xff]  ;;  %v3293_v37 = vld [vmem:[%s3200_s15 + $0xa0] sm:$0xff] }
  0xa5   : > { %2351 = vmatpush3.bf16.msra.mxu0 %v2571_v2  ;;  %v3296_v38 = vld [vmem:[%s3200_s15 + $0xa8] sm:$0xff]  ;;  %v343_v39 = vpack.c.bf16 %v3290_v36, %v3287_v35  ;;  %v3303_v41 = vld [vmem:[%s3200_s15 + $0xb0] sm:$0xff]  ;;  %v3306_v42 = vld [vmem:[%s3200_s15 + $0xb8] sm:$0xff]  ;;  %p2881_p13 = pnand %p2880_p9, %p2874_p12 }
  0xa6   : > { %2352 = vmatprep.subr.bf16.mxu0 %v2572_v3  ;;  %v344_v40 = vpack.c.bf16 %v3296_v38, %v3293_v37  ;;  %v3309_v43 = vld [vmem:[%s3200_s15 + $0xc0] sm:$0xff]  ;;  %v3312_v44 = vld [vmem:[%s3200_s15 + $0xc8] sm:$0xff]  ;;  %v345_v45 = vpack.c.bf16 %v3306_v42, %v3303_v41  ;;  %v3319_v47 = vld [vmem:[%s3200_s15 + $0xd0] sm:$0xff] }
  0xa7   : > { %v346_v46 = vpack.c.bf16 %v3312_v44, %v3309_v43  ;;  %v3322_v48 = vld [vmem:[%s3200_s15 + $0xd8] sm:$0xff]  ;;  %v3325_v49 = vld [vmem:[%s3200_s15 + $0xe0] sm:$0xff]  ;;  %v3328_v50 = vld [vmem:[%s3200_s15 + $0xe8] sm:$0xff] }
  0xa8   : > { %v347_v51 = vpack.c.bf16 %v3322_v48, %v3319_v47  ;;  %v348_v52 = vpack.c.bf16 %v3328_v50, %v3325_v49  ;;  %v3335_v53 = vld [vmem:[%s3200_s15 + $0xf0] sm:$0xff]  ;;  %v3338_v54 = vld [vmem:[%s3200_s15 + $0xf8] sm:$0xff]  ;;  %v3342_v56 = vld [vmem:[#allocation10] ss:$0 sm:$0xff] }
  0xa9   : > { %2353 = vmatpush3.bf16.msra.mxu0 %v2572_v3  ;;  %v349_v55 = vpack.c.bf16 %v3338_v54, %v3335_v53 }
  0xaa   : > { %2354 = vmatprep.subr.bf16.mxu0 %v2573_v7 }
  0xad   : > { %2355 = vmatpush3.bf16.msra.mxu0 %v2573_v7 }
  0xae   : > { %2356 = vmatprep.subr.bf16.mxu0 %v2574_v8 }
  0xb1   : > { %2357 = vmatpush3.bf16.msra.mxu0 %v2574_v8 }
  0xb2   : > { %2358 = vmatprep.subr.bf16.mxu0 %v2575_v9 }
  0xb5   : > { %2359 = vmatpush3.bf16.msra.mxu0 %v2575_v9 }
  0xb6   : > { %2360 = vmatprep.subr.bf16.mxu0 %v2576_v10 }
  0xb9   : > { %2361 = vmatpush3.bf16.msra.mxu0 %v2576_v10 }
  0xbc   : > { %2363 = vmatmul.mubr.bf16.vlgmr.msra.gmra.mrb[0].mxu0 %v335_v15 }
  0xbd   : > { %2366 = vmatprep.mubr.bf16.mxu0 %v336_v16 }
  0xc4   : > { %2367 = vmatmul.mubr.bf16.gmra.mrb[4].mxu0 %v337_v21 }
  0xc5   : > { %2370 = vmatprep.mubr.bf16.mxu0 %v338_v22 }
  0xcc   : > { %2371 = vmatmul.mubr.bf16.gmra.mrb[8].mxu0 %v339_v27 }
  0xcd   : > { %2374 = vmatprep.mubr.bf16.mxu0 %v340_v28 }
  0xd4   : > { %2375 = vmatmul.mubr.bf16.gmra.mrb[12].mxu0 %v341_v33 }
  0xd5   : > { %2378 = vmatprep.mubr.bf16.mxu0 %v342_v34 }
  0xdc   : > { %2379 = vmatmul.mubr.bf16.gmra.mrb[16].mxu0 %v343_v39 }
  0xdd   : > { %2382 = vmatprep.mubr.bf16.mxu0 %v344_v40 }
  0xe4   : > { %2383 = vmatmul.mubr.bf16.gmra.mrb[20].mxu0 %v345_v45 }
  0xe5   : > { %2386 = vmatprep.mubr.bf16.mxu0 %v346_v46 }
  0xec   : > { %2387 = vmatmul.mubr.bf16.gmra.mrb[24].mxu0 %v347_v51 }
  0xed   : > { %2390 = vmatprep.mubr.bf16.mxu0 %v348_v52 }
  0xf4   : > { %2391 = vmatmul.mubr.bf16.gmra.mrb[28].mxu0 %v349_v55 }
 0x18f   : > { %v2364_v57 = vpop.f32.mrb[0].mxu0 }
 0x190   : > { %v465_v58 = vadd.f32 %v2364_v57, %v3342_v56  ;;  %v456_v59 = vpop.f32.mrb[1].mxu0 }
 0x191   : > { %v457_v60 = vadd.f32 %v456_v59, %v3342_v56  ;;  %v2365_v61 = vpop.f32.mrb[2].mxu0 }
 0x192   : > { %v468_v62 = vadd.f32 %v2365_v61, %v3342_v56  ;;  %v459_v63 = vpop.f32.mrb[3].mxu0  ;;  %v3348_v0 = vadd.f32 %v465_v58, %v3223_v11 }
 0x193   : > { %v460_v1 = vadd.f32 %v459_v63, %v3342_v56  ;;  %v3352_v2 = vadd.f32 %v457_v60, %v3215_v4 }
 0x194   : > { %619 = vadd.xlane.f32.xlu1 %v3348_v0  ;;  %v3357_v3 = vadd.f32 %v468_v62, %v3226_v12 }
 0x195   : > { %615 = vadd.xlane.f32.xlu0 %v3352_v2  ;;  %v3360_v7 = vadd.f32 %v460_v1, %v3218_v5 }
 0x197   : > { %v2368_v6 = vpop.f32.mrb[4].mxu0 }
 0x198   : > { %621 = vadd.xlane.f32.xlu1 %v3357_v3  ;;  %v472_v8 = vpop.f32.mrb[5].mxu0  ;;  %v481_v9 = vadd.f32 %v2368_v6, %v3342_v56 }
 0x199   : > { %v473_v10 = vadd.f32 %v472_v8, %v3342_v56  ;;  %v2369_v4 = vpop.f32.mrb[6].mxu0  ;;  %617 = vadd.xlane.f32.xlu0 %v3360_v7 }
 0x19a   : > { %v475_v11 = vpop.f32.mrb[7].mxu0  ;;  %v484_v15 = vadd.f32 %v2369_v4, %v3342_v56  ;;  %v3376_v21 = vadd.f32 %v481_v9, %v3239_v17 }
 0x19b   : > { %v476_v12 = vadd.f32 %v475_v11, %v3342_v56  ;;  %v3369_v16 = vadd.f32 %v473_v10, %v3229_v13 }
 0x19c   : > { %v3380_v27 = vadd.f32 %v484_v15, %v3242_v18 }
 0x19d   : > { %623 = vadd.xlane.f32.xlu0 %v3369_v16  ;;  %v3373_v5 = vadd.f32 %v476_v12, %v3232_v14 }
 0x19f   : > { %v2372_v22 = vpop.f32.mrb[8].mxu0  ;;  %625 = vadd.xlane.f32.xlu1 %v3373_v5 }
 0x1a0   : > { %v488_v28 = vpop.f32.mrb[9].mxu0  ;;  %v497_v33 = vadd.f32 %v2372_v22, %v3342_v56 }
 0x1a1   : > { %v489_v13 = vadd.f32 %v488_v28, %v3342_v56  ;;  %v2373_v34 = vpop.f32.mrb[10].mxu0  ;;  %627 = vadd.xlane.f32.xlu0 %v3376_v21 }
 0x1a2   : > { %v491_v39 = vpop.f32.mrb[11].mxu0  ;;  %v500_v14 = vadd.f32 %v2373_v34, %v3342_v56  ;;  %v3396_v45 = vadd.f32 %v497_v33, %v3255_v23 }
 0x1a3   : > { %v492_v17 = vadd.f32 %v491_v39, %v3342_v56  ;;  %629 = vadd.xlane.f32.xlu1 %v3380_v27  ;;  %v3389_v40 = vadd.f32 %v489_v13, %v3245_v19 }
 0x1a4   : > { %v3400_v51 = vadd.f32 %v500_v14, %v3258_v24 }
 0x1a5   : > { %631 = vadd.xlane.f32.xlu0 %v3389_v40  ;;  %v3393_v18 = vadd.f32 %v492_v17, %v3248_v20 }
 0x1a7   : > { %v2376_v46 = vpop.f32.mrb[12].mxu0  ;;  %633 = vadd.xlane.f32.xlu1 %v3393_v18 }
 0x1a8   : > { %v504_v52 = vpop.f32.mrb[13].mxu0  ;;  %v513_v55 = vadd.f32 %v2376_v46, %v3342_v56 }
 0x1a9   : > { %v505_v19 = vadd.f32 %v504_v52, %v3342_v56  ;;  %v2377_v57 = vpop.f32.mrb[14].mxu0  ;;  %635 = vadd.xlane.f32.xlu0 %v3396_v45 }
 0x1aa   : > { %v507_v58 = vpop.f32.mrb[15].mxu0  ;;  %v516_v20 = vadd.f32 %v2377_v57, %v3342_v56  ;;  %v3416_v60 = vadd.f32 %v513_v55, %v3271_v29 }
 0x1ab   : > { %v508_v23 = vadd.f32 %v507_v58, %v3342_v56  ;;  %637 = vadd.xlane.f32.xlu1 %v3400_v51  ;;  %v3409_v59 = vadd.f32 %v505_v19, %v3261_v25 }
 0x1ac   : > { %v3420_v62 = vadd.f32 %v516_v20, %v3274_v30 }
 0x1ad   : > { %639 = vadd.xlane.f32.xlu0 %v3409_v59  ;;  %v3413_v24 = vadd.f32 %v508_v23, %v3264_v26 }
 0x1af   : > { %v2380_v61 = vpop.f32.mrb[16].mxu0  ;;  %641 = vadd.xlane.f32.xlu1 %v3413_v24 }
 0x1b0   : > { %v520_v63 = vpop.f32.mrb[17].mxu0  ;;  %v529_v1 = vadd.f32 %v2380_v61, %v3342_v56 }
 0x1b1   : > { %v521_v25 = vadd.f32 %v520_v63, %v3342_v56  ;;  %v2381_v6 = vpop.f32.mrb[18].mxu0  ;;  %643 = vadd.xlane.f32.xlu0 %v3416_v60  ;;  %v2577_v63 = vld [vmem:[#allocation7 + $0x4] ss:$8 sps:$4 sm:$0xff]  }
 0x1b2   : > { %v523_v8 = vpop.f32.mrb[19].mxu0  ;;  %v532_v26 = vadd.f32 %v2381_v6, %v3342_v56  ;;  %v3436_v10 = vadd.f32 %v529_v1, %v3287_v35  ;;  %v2579_v1 = vld [vmem:[#allocation7] ss:$8 sps:$4 sm:$0xff]   ;;  %1155 = vmatprep.subr.bf16.mxu1 %v2577_v63 }
 0x1b3   : > { %v524_v29 = vadd.f32 %v523_v8, %v3342_v56  ;;  %645 = vadd.xlane.f32.xlu1 %v3420_v62  ;;  %v3429_v9 = vadd.f32 %v521_v25, %v3277_v31  ;;  %v2580_v25 = vld [vmem:[#allocation7 + $0x14] ss:$8 sps:$4 sm:$0xff]   ;;  %1156 = vmatpush1.bf16.msra.mxu1 %v2579_v1 }
 0x1b4   : > { %v3440_v4 = vadd.f32 %v532_v26, %v3290_v36  ;;  %1157 = vmatprep.subr.bf16.mxu1 %v2580_v25 }
 0x1b5   : > { %647 = vadd.xlane.f32.xlu0 %v3429_v9  ;;  %v3433_v30 = vadd.f32 %v524_v29, %v3280_v32 }
 0x1b7   : > { %649 = vadd.xlane.f32.xlu1 %v3433_v30  ;;  %v2384_v11 = vpop.f32.mrb[20].mxu0 }
 0x1b8   : > { %v545_v15 = vadd.f32 %v2384_v11, %v3342_v56  ;;  %v536_v12 = vpop.f32.mrb[21].mxu0 }
 0x1b9   : > { %651 = vadd.xlane.f32.xlu0 %v3436_v10  ;;  %v537_v31 = vadd.f32 %v536_v12, %v3342_v56  ;;  %v2385_v22 = vpop.f32.mrb[22].mxu0 }
 0x1ba   : > { %v548_v32 = vadd.f32 %v2385_v22, %v3342_v56  ;;  %v539_v28 = vpop.f32.mrb[23].mxu0 }
 0x1bb   : > { %653 = vadd.xlane.f32.xlu1 %v3440_v4  ;;  %v540_v35 = vadd.f32 %v539_v28, %v3342_v56 }
 0x1bf   : > { %v2388_v33 = vpop.f32.mrb[24].mxu0 }
 0x1c0   : > { %v3449_v36 = vadd.f32 %v2388_v33, %v3342_v56  ;;  %v552_v13 = vpop.f32.mrb[25].mxu0  ;;  %v3476_v33 = vadd.f32 %v537_v31, %v3293_v37  ;;  %v3490_v37 = vadd.f32 %v540_v35, %v3296_v38  ;;  %v2582_v38 = vld [vmem:[#allocation7 + $0x10] ss:$8 sps:$4 sm:$0xff]   ;;  %v3506_v35 = vadd.f32 %v548_v32, %v3306_v42 }
 0x1c1   : > { %v553_v34 = vadd.f32 %v552_v13, %v3342_v56  ;;  %v2389_v39 = vpop.f32.mrb[26].mxu0  ;;  %1158 = vmatpush1.bf16.msra.mxu1 %v2582_v38 }
 0x1c2   : > { %v3453_v14 = vadd.f32 %v2389_v39, %v3342_v56  ;;  %v555_v17 = vpop.f32.mrb[27].mxu0 }
 0x1c3   : > { %v3456_v46 = vadd.f32 %v555_v17, %v3342_v56 }
 0x1c4   : > { %v3545_v38 = vadd.f32 %v3453_v14, %v3322_v48 }
 0x1c7   : > { %v2392_v52 = vpop.f32.mrb[28].mxu0 }
 0x1c8   : > { %v3459_v55 = vadd.f32 %v2392_v52, %v3342_v56  ;;  %v568_v19 = vpop.f32.mrb[29].mxu0 }
 0x1c9   : > { %v3462_v57 = vadd.f32 %v568_v19, %v3342_v56  ;;  %v2393_v58 = vpop.f32.mrb[30].mxu0 }
 0x1ca   : > { %v3465_v20 = vadd.f32 %v2393_v58, %v3342_v56  ;;  %v571_v23 = vpop.f32.mrb[31].mxu0 }
 0x1cb   : > { %v3468_v61 = vadd.f32 %v571_v23, %v3342_v56  ;;  %v3497_v23 = vadd.f32 %v545_v15, %v3303_v41 }
 0x221   : > { %v620_v6 = vpop.xlane.xlu1 %619 }
 0x222   : > { %v616_v8 = vpop.xlane.xlu0 %615  ;;  %v682_v12 = vmul.f32 0.0078125, %v620_v6 }
 0x223   : > { %v680_v26 = vmul.f32 0.0078125, %v616_v8  ;;  %v2583_v8 = vld [vmem:[#allocation7 + $0x24] ss:$8 sps:$4 sm:$0xff]  }
 0x224   : > { %1159 = vmatprep.subr.bf16.mxu1 %v2583_v8 }
 0x225   : > { %v3471_v29 = vsub.f32 %v3352_v2, %v680_v26  ;;  %v622_v56 = vpop.xlane.xlu1 %621  ;;  %v3484_v2 = vsub.f32 %v3348_v0, %v682_v12  ;;  %v2585_v26 = vld [vmem:[#allocation7 + $0x20] ss:$8 sps:$4 sm:$0xff]  }
 0x226   : > { %v618_v11 = vpop.xlane.xlu0 %617  ;;  %v683_v39 = vmul.f32 0.0078125, %v622_v56  ;;  %1160 = vmatpush1.bf16.msra.mxu1 %v2585_v26  ;;  %v2598_v26 = vld [vmem:[#allocation7 + $0x74] ss:$8 sps:$4 sm:$0xff]  }
 0x227   : > { %v681_v22 = vmul.f32 0.0078125, %v618_v11  ;;  %v744_v28 = vmul.f32 %v3471_v29, %v3471_v29  ;;  %v746_v58 = vmul.f32 %v3484_v2, %v3484_v2 }
 0x229   : > { %776 = vadd.xlane.f32.xlu0 %v744_v28  ;;  %v3479_v13 = vsub.f32 %v3360_v7, %v681_v22  ;;  %v3493_v7 = vsub.f32 %v3357_v3, %v683_v39  ;;  %v2588_v22 = vld [vmem:[#allocation7 + $0x30] ss:$8 sps:$4 sm:$0xff]  }
 0x22a   : > { %v624_v52 = vpop.xlane.xlu0 %623 }
 0x22b   : > { %v745_v17 = vmul.f32 %v3479_v13, %v3479_v13  ;;  %v684_v19 = vmul.f32 0.0078125, %v624_v52  ;;  %v747_v63 = vmul.f32 %v3493_v7, %v3493_v7  ;;  %v2591_v52 = vld [vmem:[#allocation7 + $0x40] ss:$8 sps:$4 sm:$0xff]  }
 0x22c   : > { %v626_v31 = vpop.xlane.xlu1 %625 }
 0x22d   : > { %655 = vadd.xlane.f32.xlu0 %v3476_v33  ;;  %778 = vadd.xlane.f32.xlu1 %v745_v17  ;;  %v685_v0 = vmul.f32 0.0078125, %v626_v31  ;;  %v3502_v1 = vsub.f32 %v3369_v16, %v684_v19  ;;  %v3515_v16 = vadd.f32 %v553_v34, %v3309_v43  ;;  %v3525_v34 = vadd.f32 %v3456_v46, %v3312_v44  ;;  %v2589_v17 = vld [vmem:[#allocation7 + $0x44] ss:$8 sps:$4 sm:$0xff]   ;;  %v2592_v31 = vld [vmem:[#allocation7 + $0x54] ss:$8 sps:$4 sm:$0xff]  }
 0x22e   : > { %v628_v25 = vpop.xlane.xlu0 %627  ;;  %v3537_v44 = vadd.f32 %v3449_v36, %v3319_v47  ;;  %v2595_v36 = vld [vmem:[#allocation7 + $0x64] ss:$8 sps:$4 sm:$0xff]  }
 0x22f   : > { %v686_v3 = vmul.f32 0.0078125, %v628_v25  ;;  %v748_v6 = vmul.f32 %v3502_v1, %v3502_v1  ;;  %v3511_v41 = vsub.f32 %v3373_v5, %v685_v0  ;;  %v2586_v5 = vld [vmem:[#allocation7 + $0x34] ss:$8 sps:$4 sm:$0xff]   ;;  %v2594_v0 = vld [vmem:[#allocation7 + $0x50] ss:$8 sps:$4 sm:$0xff]  }
 0x230   : > { %v630_v15 = vpop.xlane.xlu1 %629  ;;  %1161 = vmatprep.subr.bf16.mxu1 %v2586_v5 }
 0x231   : > { %780 = vadd.xlane.f32.xlu0 %v746_v58  ;;  %657 = vadd.xlane.f32.xlu1 %v3490_v37  ;;  %v687_v42 = vmul.f32 0.0078125, %v630_v15  ;;  %v749_v32 = vmul.f32 %v3511_v41, %v3511_v41  ;;  %v3520_v12 = vsub.f32 %v3376_v21, %v686_v3  ;;  %v3555_v3 = vadd.f32 %v3462_v57, %v3325_v49 }
 0x232   : > { %v632_v11 = vpop.xlane.xlu0 %631  ;;  %1162 = vmatpush1.bf16.msra.mxu1 %v2588_v22  ;;  %v3565_v57 = vadd.f32 %v3468_v61, %v3328_v50  ;;  %v3578_v61 = vadd.f32 %v3459_v55, %v3335_v53 }
 0x233   : > { %v688_v43 = vmul.f32 0.0078125, %v632_v11  ;;  %v750_v56 = vmul.f32 %v3520_v12, %v3520_v12  ;;  %v3530_v39 = vsub.f32 %v3380_v27, %v687_v42  ;;  %1163 = vmatprep.subr.bf16.mxu1 %v2589_v17  ;;  %v2600_v11 = vld [vmem:[#allocation7 + $0x70] ss:$8 sps:$4 sm:$0xff]  }
 0x234   : > { %v634_v28 = vpop.xlane.xlu1 %633 }
 0x235   : > { %659 = vadd.xlane.f32.xlu0 %v3497_v23  ;;  %782 = vadd.xlane.f32.xlu1 %v747_v63  ;;  %v689_v19 = vmul.f32 0.0078125, %v634_v28  ;;  %v751_v58 = vmul.f32 %v3530_v39, %v3530_v39  ;;  %v3540_v46 = vsub.f32 %v3389_v40, %v688_v43  ;;  %v2956_v28 = vmov 0  }
 0x236   : > { %v636_v21 = vpop.xlane.xlu0 %635  ;;  %1164 = vmatpush1.bf16.msra.mxu1 %v2591_v52  ;;  %1187 = vmatprep.mubr.bf16.mxu1 %v2956_v28 }
 0x237   : > { %1165 = vmatprep.subr.bf16.mxu1 %v2592_v31  ;;  %v690_v25 = vmul.f32 0.0078125, %v636_v21  ;;  %v752_v47 = vmul.f32 %v3540_v46, %v3540_v46  ;;  %v3550_v40 = vsub.f32 %v3393_v18, %v689_v19  ;;  %v3589_v19 = vadd.f32 %v3465_v20, %v3338_v54 }
 0x238   : > { %v638_v27 = vpop.xlane.xlu1 %637 }
 0x239   : > { %661 = vadd.xlane.f32.xlu1 %v3506_v35  ;;  %784 = vadd.xlane.f32.xlu0 %v748_v6  ;;  %v2597_v6 = vld [vmem:[#allocation7 + $0x60] ss:$8 sps:$4 sm:$0xff]   ;;  %v691_v48 = vmul.f32 0.0078125, %v638_v27  ;;  %v753_v14 = vmul.f32 %v3550_v40, %v3550_v40  ;;  %v3560_v8 = vsub.f32 %v3396_v45, %v690_v25 }
 0x23a   : > { %v640_v63 = vpop.xlane.xlu0 %639  ;;  %1166 = vmatpush1.bf16.msra.mxu1 %v2594_v0 }
 0x23b   : > { %1167 = vmatprep.subr.bf16.mxu1 %v2595_v36  ;;  %v692_v49 = vmul.f32 0.0078125, %v640_v63  ;;  %v754_v42 = vmul.f32 %v3560_v8, %v3560_v8 }
 0x23c   : > { %v642_v15 = vpop.xlane.xlu1 %641 }
 0x23d   : > { %786 = vadd.xlane.f32.xlu1 %v749_v32  ;;  %663 = vadd.xlane.f32.xlu0 %v3515_v16  ;;  %v3570_v32 = vsub.f32 %v3400_v51, %v691_v48  ;;  %v693_v5 = vmul.f32 0.0078125, %v642_v15  ;;  %v3581_v51 = vsub.f32 %v3409_v59, %v692_v49 }
 0x23e   : > { %1168 = vmatpush1.bf16.msra.mxu1 %v2597_v6  ;;  %v644_v18 = vpop.xlane.xlu0 %643 }
 0x23f   : > { %1169 = vmatprep.subr.bf16.mxu1 %v2598_v26  ;;  %v694_v43 = vmul.f32 0.0078125, %v644_v18  ;;  %v755_v50 = vmul.f32 %v3570_v32, %v3570_v32  ;;  %v3585_v17 = vsub.f32 %v3413_v24, %v693_v5  ;;  %v756_v53 = vmul.f32 %v3581_v51, %v3581_v51 }
 0x240   : > { %v646_v45 = vpop.xlane.xlu1 %645 }
 0x241   : > { %665 = vadd.xlane.f32.xlu1 %v3525_v34  ;;  %788 = vadd.xlane.f32.xlu0 %v750_v56  ;;  %v695_v56 = vmul.f32 0.0078125, %v646_v45  ;;  %v3594_v55 = vsub.f32 %v3416_v60, %v694_v43 }
 0x242   : > { %1170 = vmatpush1.bf16.msra.mxu1 %v2600_v11  ;;  %v648_v22 = vpop.xlane.xlu0 %647 }
 0x243   : > { %v696_v52 = vmul.f32 0.0078125, %v648_v22  ;;  %v3600_v24 = vsub.f32 %v3420_v62, %v695_v56  ;;  %v758_v54 = vmul.f32 %v3594_v55, %v3594_v55 }
 0x244   : > { %v650_v21 = vpop.xlane.xlu1 %649 }
 0x245   : > { %790 = vadd.xlane.f32.xlu1 %v751_v58  ;;  %667 = vadd.xlane.f32.xlu0 %v3537_v44  ;;  %v757_v58 = vmul.f32 %v3585_v17, %v3585_v17  ;;  %v697_v27 = vmul.f32 0.0078125, %v650_v21  ;;  %v3605_v20 = vsub.f32 %v3429_v9, %v696_v52  ;;  %v759_v0 = vmul.f32 %v3600_v24, %v3600_v24 }
 0x246   : > { %v652_v59 = vpop.xlane.xlu0 %651 }
 0x247   : > { %v698_v31 = vmul.f32 0.0078125, %v652_v59  ;;  %v760_v25 = vmul.f32 %v3605_v20, %v3605_v20  ;;  %v3612_v62 = vsub.f32 %v3433_v30, %v697_v27 }
 0x248   : > { %v654_v60 = vpop.xlane.xlu1 %653 }
 0x249   : > { %669 = vadd.xlane.f32.xlu1 %v3545_v38  ;;  %792 = vadd.xlane.f32.xlu0 %v752_v47  ;;  %v699_v63 = vmul.f32 0.0078125, %v654_v60  ;;  %v3615_v47 = vsub.f32 %v3436_v10, %v698_v31  ;;  %v761_v9 = vmul.f32 %v3612_v62, %v3612_v62 }
 0x24b   : > { %v762_v36 = vmul.f32 %v3615_v47, %v3615_v47  ;;  %v3622_v6 = vsub.f32 %v3440_v4, %v699_v63 }
 0x24d   : > { %794 = vadd.xlane.f32.xlu1 %v753_v14  ;;  %671 = vadd.xlane.f32.xlu0 %v3555_v3  ;;  %v763_v30 = vmul.f32 %v3622_v6, %v3622_v6 }
 0x251   : > { %673 = vadd.xlane.f32.xlu1 %v3565_v57  ;;  %796 = vadd.xlane.f32.xlu0 %v754_v42 }
 0x255   : > { %798 = vadd.xlane.f32.xlu1 %v755_v50  ;;  %675 = vadd.xlane.f32.xlu0 %v3578_v61 }
 0x259   : > { %677 = vadd.xlane.f32.xlu1 %v3589_v19  ;;  %800 = vadd.xlane.f32.xlu0 %v756_v53 }
 0x25d   : > { %802 = vadd.xlane.f32.xlu1 %v757_v58  ;;  %804 = vadd.xlane.f32.xlu0 %v758_v54 }
 0x261   : > { %806 = vadd.xlane.f32.xlu1 %v759_v0  ;;  %808 = vadd.xlane.f32.xlu0 %v760_v25 }
 0x265   : > { %810 = vadd.xlane.f32.xlu1 %v761_v9  ;;  %812 = vadd.xlane.f32.xlu0 %v762_v36  ;;  %v3642_v9 = vld [vmem:[#allocation10 + $0x1] ss:$0 sm:$0xff] }
 0x269   : > { %814 = vadd.xlane.f32.xlu1 %v763_v30 }
 0x2b6   : > { %v777_v15 = vpop.xlane.xlu0 %776 }
 0x2b7   : > { %v840_v10 = vmul.f32 0.0078125, %v777_v15 }
 0x2b9   : > { %v872_v48 = vadd.f32 1e-05, %v840_v10 }
 0x2ba   : > { %v779_v14 = vpop.xlane.xlu1 %778  ;;  %v656_v18 = vpop.xlane.xlu0 %655 }
 0x2bb   : > { %2601 = vrsqrt.f32 %v872_v48  ;;  %v841_v26 = vmul.f32 0.0078125, %v779_v14  ;;  %v700_v11 = vmul.f32 0.0078125, %v656_v18 }
 0x2bd   : > { %v873_v49 = vadd.f32 1e-05, %v841_v26  ;;  %v3627_v42 = vsub.f32 %v3476_v33, %v700_v11  ;;  %v3651_v11 = vld [vmem:[#allocation10 + $0x2] ss:$0 sm:$0xff] }
 0x2be   : > { %v658_v4 = vpop.xlane.xlu1 %657  ;;  %v781_v45 = vpop.xlane.xlu0 %780 }
 0x2bf   : > { %2603 = vrsqrt.f32 %v873_v49  ;;  %v701_v5 = vmul.f32 0.0078125, %v658_v4  ;;  %v842_v22 = vmul.f32 0.0078125, %v781_v45  ;;  %v764_v43 = vmul.f32 %v3627_v42, %v3627_v42 }
 0x2c1   : > { %v874_v50 = vadd.f32 1e-05, %v842_v22  ;;  %816 = vadd.xlane.f32.xlu0 %v764_v43  ;;  %v3632_v56 = vsub.f32 %v3490_v37, %v701_v5 }
 0x2c2   : > { %v783_v21 = vpop.xlane.xlu1 %782  ;;  %v660_v52 = vpop.xlane.xlu0 %659 }
 0x2c3   : > { %2605 = vrsqrt.f32 %v874_v50  ;;  %v843_v53 = vmul.f32 0.0078125, %v783_v21  ;;  %v702_v59 = vmul.f32 0.0078125, %v660_v52  ;;  %v765_v33 = vmul.f32 %v3632_v56, %v3632_v56 }
 0x2c5   : > { %v2602_v58 = vpop.eup %2601  ;;  %v875_v27 = vadd.f32 1e-05, %v843_v53  ;;  %818 = vadd.xlane.f32.xlu1 %v765_v33  ;;  %v3637_v31 = vsub.f32 %v3497_v23, %v702_v59 }
 0x2c6   : > { %v662_v54 = vpop.xlane.xlu1 %661  ;;  %v785_v60 = vpop.xlane.xlu0 %784  ;;  %v936_v0 = vmul.f32 %v2602_v58, %v3471_v29 }
 0x2c7   : > { %2607 = vrsqrt.f32 %v875_v27  ;;  %v703_v37 = vmul.f32 0.0078125, %v662_v54  ;;  %v844_v63 = vmul.f32 0.0078125, %v785_v60  ;;  %v766_v25 = vmul.f32 %v3637_v31, %v3637_v31 }
 0x2c8   : > { %v968_v29 = vmul.f32 %v936_v0, %v3642_v9 }
 0x2c9   : > { %v2604_v36 = vpop.eup %2603  ;;  %v876_v30 = vadd.f32 1e-05, %v844_v63  ;;  %820 = vadd.xlane.f32.xlu0 %v766_v25  ;;  %v3645_v15 = vsub.f32 %v3506_v35, %v703_v37 }
 0x2ca   : > { %v787_v23 = vpop.xlane.xlu1 %786  ;;  %v664_v10 = vpop.xlane.xlu0 %663  ;;  %v937_v48 = vmul.f32 %v2604_v36, %v3479_v13  ;;  %v3658_v22 = vadd.f32 %v968_v29, %v3651_v11 }
 0x2cb   : > { %2609 = vrsqrt.f32 %v876_v30  ;;  %v845_v14 = vmul.f32 0.0078125, %v787_v23  ;;  %v704_v18 = vmul.f32 0.0078125, %v664_v10  ;;  %v767_v26 = vmul.f32 %v3645_v15, %v3645_v15 }
 0x2cc   : > { %v969_v49 = vmul.f32 %v937_v48, %v3642_v9 }
 0x2cd   : > { %v2606_v4 = vpop.eup %2605  ;;  %v877_v45 = vadd.f32 1e-05, %v845_v14  ;;  %v3655_v35 = vsub.f32 %v3515_v16, %v704_v18  ;;  %822 = vadd.xlane.f32.xlu1 %v767_v26 }
 0x2ce   : > { %v666_v5 = vpop.xlane.xlu1 %665  ;;  %v789_v13 = vpop.xlane.xlu0 %788  ;;  %v3661_v43 = vadd.f32 %v969_v49, %v3651_v11  ;;  %v938_v50 = vmul.f32 %v2606_v4, %v3484_v2 }
 0x2cf   : > { %2611 = vrsqrt.f32 %v877_v45  ;;  %v705_v21 = vmul.f32 0.0078125, %v666_v5  ;;  %v846_v52 = vmul.f32 0.0078125, %v789_v13  ;;  %v768_v53 = vmul.f32 %v3655_v35, %v3655_v35 }
 0x2d0   : > { %v1032_v16 = vpack.c.bf16 %v3661_v43, %v3658_v22  ;;  %v970_v60 = vmul.f32 %v938_v50, %v3642_v9 }
 0x2d1   : > { %v2608_v59 = vpop.eup %2607  ;;  %v3669_v33 = vsub.f32 %v3525_v34, %v705_v21  ;;  %v878_v58 = vadd.f32 1e-05, %v846_v52  ;;  %824 = vadd.xlane.f32.xlu0 %v768_v53 }
 0x2d2   : > { %v791_v27 = vpop.xlane.xlu1 %790  ;;  %1188 = vmatmul.mubr.bf16.vlgmr.msra.gmra.mrb[0].mxu1 %v1032_v16  ;;  %v668_v54 = vpop.xlane.xlu0 %667  ;;  %v939_v2 = vmul.f32 %v2608_v59, %v3493_v7  ;;  %v3681_v10 = vadd.f32 %v970_v60, %v3651_v11 }
 0x2d3   : > { %2613 = vrsqrt.f32 %v878_v58  ;;  %v847_v0 = vmul.f32 0.0078125, %v791_v27  ;;  %v706_v37 = vmul.f32 0.0078125, %v668_v54  ;;  %v769_v63 = vmul.f32 %v3669_v33, %v3669_v33  ;;  %1197 = vmatprep.mubr.bf16.mxu1 %v2956_v28 }
 0x2d4   : > { %v971_v34 = vmul.f32 %v939_v2, %v3642_v9 }
 0x2d5   : > { %v2610_v25 = vpop.eup %2609  ;;  %v879_v36 = vadd.f32 1e-05, %v847_v0  ;;  %v3678_v30 = vsub.f32 %v3537_v44, %v706_v37  ;;  %826 = vadd.xlane.f32.xlu1 %v769_v63 }
 0x2d6   : > { %v670_v23 = vpop.xlane.xlu1 %669  ;;  %v793_v7 = vpop.xlane.xlu0 %792  ;;  %v3684_v48 = vadd.f32 %v971_v34, %v3651_v11  ;;  %v940_v29 = vmul.f32 %v2610_v25, %v3502_v1 }
 0x2d7   : > { %2615 = vrsqrt.f32 %v879_v36  ;;  %v707_v14 = vmul.f32 0.0078125, %v670_v23  ;;  %v848_v18 = vmul.f32 0.0078125, %v793_v7  ;;  %v770_v26 = vmul.f32 %v3678_v30, %v3678_v30 }
 0x2d8   : > { %v1033_v44 = vpack.c.bf16 %v3684_v48, %v3681_v10  ;;  %v972_v50 = vmul.f32 %v940_v29, %v3642_v9 }
 0x2d9   : > { %v2612_v49 = vpop.eup %2611  ;;  %v3692_v4 = vsub.f32 %v3545_v38, %v707_v14  ;;  %v880_v45 = vadd.f32 1e-05, %v848_v18  ;;  %828 = vadd.xlane.f32.xlu0 %v770_v26 }
 0x2da   : > { %v795_v5 = vpop.xlane.xlu1 %794  ;;  %1198 = vmatmul.mubr.bf16.gmra.mrb[4].mxu1 %v1033_v44  ;;  %v672_v13 = vpop.xlane.xlu0 %671  ;;  %v941_v1 = vmul.f32 %v2612_v49, %v3511_v41  ;;  %v3704_v54 = vadd.f32 %v972_v50, %v3651_v11 }
 0x2db   : > { %2617 = vrsqrt.f32 %v880_v45  ;;  %v849_v21 = vmul.f32 0.0078125, %v795_v5  ;;  %v708_v52 = vmul.f32 0.0078125, %v672_v13  ;;  %v771_v53 = vmul.f32 %v3692_v4, %v3692_v4  ;;  %1207 = vmatprep.mubr.bf16.mxu1 %v2956_v28 }
 0x2dc   : > { %v973_v38 = vmul.f32 %v941_v1, %v3642_v9 }
 0x2dd   : > { %v2614_v16 = vpop.eup %2613  ;;  %v881_v59 = vadd.f32 1e-05, %v849_v21  ;;  %v3701_v58 = vsub.f32 %v3555_v3, %v708_v52  ;;  %830 = vadd.xlane.f32.xlu1 %v771_v53 }
 0x2de   : > { %v674_v27 = vpop.xlane.xlu1 %673  ;;  %v797_v41 = vpop.xlane.xlu0 %796  ;;  %v3707_v2 = vadd.f32 %v973_v38, %v3651_v11  ;;  %v942_v60 = vmul.f32 %v2614_v16, %v3520_v12 }
 0x2df   : > { %2619 = vrsqrt.f32 %v881_v59  ;;  %v709_v0 = vmul.f32 0.0078125, %v674_v27  ;;  %v850_v37 = vmul.f32 0.0078125, %v797_v41  ;;  %v772_v63 = vmul.f32 %v3701_v58, %v3701_v58 }
 0x2e0   : > { %v1034_v3 = vpack.c.bf16 %v3707_v2, %v3704_v54  ;;  %v974_v29 = vmul.f32 %v942_v60, %v3642_v9 }
 0x2e1   : > { %v2616_v34 = vpop.eup %2615  ;;  %v3715_v25 = vsub.f32 %v3565_v57, %v709_v0  ;;  %v882_v36 = vadd.f32 1e-05, %v850_v37  ;;  %832 = vadd.xlane.f32.xlu0 %v772_v63 }
 0x2e2   : > { %v799_v23 = vpop.xlane.xlu1 %798  ;;  %1208 = vmatmul.mubr.bf16.gmra.mrb[8].mxu1 %v1034_v3  ;;  %v676_v7 = vpop.xlane.xlu0 %675  ;;  %v943_v12 = vmul.f32 %v2616_v34, %v3530_v39  ;;  %v3727_v13 = vadd.f32 %v974_v29, %v3651_v11  ;;  %v1412_v3 = vld [vmem:[#allocation8] sm:$0xff] }
 0x2e3   : > { %2621 = vrsqrt.f32 %v882_v36  ;;  %v851_v14 = vmul.f32 0.0078125, %v799_v23  ;;  %v710_v18 = vmul.f32 0.0078125, %v676_v7  ;;  %v773_v26 = vmul.f32 %v3715_v25, %v3715_v25  ;;  %1217 = vmatprep.mubr.bf16.mxu1 %v2956_v28 }
 0x2e4   : > { %v975_v57 = vmul.f32 %v943_v12, %v3642_v9 }
 0x2e5   : > { %v2618_v44 = vpop.eup %2617  ;;  %v883_v49 = vadd.f32 1e-05, %v851_v14  ;;  %v3724_v45 = vsub.f32 %v3578_v61, %v710_v18  ;;  %834 = vadd.xlane.f32.xlu1 %v773_v26 }
 0x2e6   : > { %v678_v5 = vpop.xlane.xlu1 %677  ;;  %v801_v39 = vpop.xlane.xlu0 %800  ;;  %v3730_v1 = vadd.f32 %v975_v57, %v3651_v11  ;;  %v944_v50 = vmul.f32 %v2618_v44, %v3540_v46 }
 0x2e7   : > { %2623 = vrsqrt.f32 %v883_v49  ;;  %v711_v21 = vmul.f32 0.0078125, %v678_v5  ;;  %v852_v52 = vmul.f32 0.0078125, %v801_v39  ;;  %v774_v53 = vmul.f32 %v3724_v45, %v3724_v45  ;;  %v1414_v49 = vld [vmem:[#allocation8 + $0x10] sm:$0xff]  ;;  %v1415_v5 = vld [vmem:[#allocation8 + $0x18] sm:$0xff] }
 0x2e8   : > { %v1035_v61 = vpack.c.bf16 %v3730_v1, %v3727_v13  ;;  %v976_v60 = vmul.f32 %v944_v50, %v3642_v9  ;;  %v2398_v50 = vpack.c.bf16 %v1415_v5, %v1414_v49 }
 0x2e9   : > { %v2620_v38 = vpop.eup %2619  ;;  %v3738_v16 = vsub.f32 %v3589_v19, %v711_v21  ;;  %v884_v59 = vadd.f32 1e-05, %v852_v52  ;;  %836 = vadd.xlane.f32.xlu0 %v774_v53  ;;  %v1413_v19 = vld [vmem:[#allocation8 + $0x8] sm:$0xff] }
 0x2ea   : > { %v803_v27 = vpop.xlane.xlu1 %802  ;;  %1218 = vmatmul.mubr.bf16.gmra.mrb[12].mxu1 %v1035_v61  ;;  %v805_v41 = vpop.xlane.xlu0 %804  ;;  %v945_v46 = vmul.f32 %v2620_v38, %v3550_v40  ;;  %v2395_v36 = vpack.c.bf16 %v1413_v19, %v1412_v3  ;;  %v2957_v40 = vmov 0.0|0.0   ;;  %v3748_v18 = vadd.f32 %v976_v60, %v3651_v11 }
 0x2eb   : > { %2625 = vrsqrt.f32 %v884_v59  ;;  %v853_v0 = vmul.f32 0.0078125, %v803_v27  ;;  %v854_v37 = vmul.f32 0.0078125, %v805_v41  ;;  %v775_v63 = vmul.f32 %v3738_v16, %v3738_v16  ;;  %1227 = vmatprep.mubr.bf16.mxu1 %v2956_v28  ;;  %2394 = vmatprep.subr.bf16.mxu0 %v2957_v40  ;;  %v1416_v27 = vld [vmem:[#allocation8 + $0x20] sm:$0xff]  ;;  %v1417_v41 = vld [vmem:[#allocation8 + $0x28] sm:$0xff] }
 0x2ec   : > { %v977_v34 = vmul.f32 %v945_v46, %v3642_v9  ;;  %2396 = vmatpush1.bf16.msra.mxu0 %v2395_v36  ;;  %2442 = vmatprep.subr.bf16.mxu1 %v2957_v40  ;;  %v2401_v60 = vpack.c.bf16 %v1417_v41, %v1416_v27  ;;  %v1422_v41 = vld [vmem:[#allocation8 + $0x50] sm:$0xff] }
 0x2ed   : > { %v2622_v23 = vpop.eup %2621  ;;  %v885_v7 = vadd.f32 1e-05, %v853_v0  ;;  %v886_v12 = vadd.f32 1e-05, %v854_v37  ;;  %838 = vadd.xlane.f32.xlu1 %v775_v63  ;;  %2397 = vmatprep.subr.bf16.mxu0 %v2957_v40 }
 0x2ee   : > { %v807_v29 = vpop.xlane.xlu1 %806  ;;  %v809_v14 = vpop.xlane.xlu0 %808  ;;  %v3751_v26 = vadd.f32 %v977_v34, %v3651_v11  ;;  %v946_v57 = vmul.f32 %v2622_v23, %v3560_v8  ;;  %2458 = vmatpush1.bf16.msra.mxu1 %v2395_v36 }
 0x2ef   : > { %2627 = vrsqrt.f32 %v885_v7  ;;  %v855_v44 = vmul.f32 0.0078125, %v807_v29  ;;  %2443 = vmatprep.subr.bf16.mxu1 %v2957_v40  ;;  %v856_v8 = vmul.f32 0.0078125, %v809_v14  ;;  %v1418_v7 = vld [vmem:[#allocation8 + $0x30] sm:$0xff] }
 0x2f0   : > { %v1036_v39 = vpack.c.bf16 %v3751_v26, %v3748_v18  ;;  %2629 = vrsqrt.f32 %v886_v12  ;;  %v978_v38 = vmul.f32 %v946_v57, %v3642_v9  ;;  %2399 = vmatpush1.bf16.msra.mxu0 %v2398_v50  ;;  %v1419_v12 = vld [vmem:[#allocation8 + $0x38] sm:$0xff] }
 0x2f1   : > { %v2624_v21 = vpop.eup %2623  ;;  %v887_v52 = vadd.f32 1e-05, %v855_v44  ;;  %2400 = vmatprep.subr.bf16.mxu0 %v2957_v40  ;;  %v888_v37 = vadd.f32 1e-05, %v856_v8  ;;  %v2404_v14 = vpack.c.bf16 %v1419_v12, %v1418_v7  ;;  %v1427_v7 = vld [vmem:[#allocation8 + $0x78] sm:$0xff] }
 0x2f2   : > { %v811_v53 = vpop.xlane.xlu1 %810  ;;  %1228 = vmatmul.mubr.bf16.gmra.mrb[16].mxu1 %v1036_v39  ;;  %v947_v61 = vmul.f32 %v2624_v21, %v3570_v32  ;;  %v813_v32 = vpop.xlane.xlu0 %812  ;;  %v3766_v19 = vadd.f32 %v978_v38, %v3651_v11  ;;  %v1421_v21 = vld [vmem:[#allocation8 + $0x48] sm:$0xff] }
 0x2f3   : > { %2631 = vrsqrt.f32 %v887_v52  ;;  %v857_v59 = vmul.f32 0.0078125, %v811_v53  ;;  %1237 = vmatprep.mubr.bf16.mxu1 %v2956_v28  ;;  %2459 = vmatpush1.bf16.msra.mxu1 %v2398_v50  ;;  %v858_v44 = vmul.f32 0.0078125, %v813_v32  ;;  %v1420_v50 = vld [vmem:[#allocation8 + $0x40] sm:$0xff]  ;;  %v1425_v32 = vld [vmem:[#allocation8 + $0x68] sm:$0xff] }
 0x2f4   : > { %v979_v46 = vmul.f32 %v947_v61, %v3642_v9  ;;  %2444 = vmatprep.subr.bf16.mxu1 %v2957_v40  ;;  %2402 = vmatpush1.bf16.msra.mxu0 %v2401_v60  ;;  %v2407_v8 = vpack.c.bf16 %v1421_v21, %v1420_v50  ;;  %v1429_v50 = vld [vmem:[#allocation8 + $0x88] sm:$0xff] }
 0x2f5   : > { %v2626_v0 = vpop.eup %2625  ;;  %v889_v63 = vadd.f32 1e-05, %v857_v59  ;;  %2403 = vmatprep.subr.bf16.mxu0 %v2957_v40  ;;  %v890_v61 = vadd.f32 1e-05, %v858_v44 }
 0x2f6   : > { %v815_v3 = vpop.xlane.xlu1 %814  ;;  %v3769_v34 = vadd.f32 %v979_v46, %v3651_v11  ;;  %v948_v36 = vmul.f32 %v2626_v0, %v3581_v51  ;;  %v1423_v46 = vld [vmem:[#allocation8 + $0x58] sm:$0xff] }
 0x2f7   : > { %2633 = vrsqrt.f32 %v889_v63  ;;  %v859_v23 = vmul.f32 0.0078125, %v815_v3  ;;  %2460 = vmatpush1.bf16.msra.mxu1 %v2401_v60 }
 0x2f8   : > { %v1037_v29 = vpack.c.bf16 %v3769_v34, %v3766_v19  ;;  %2635 = vrsqrt.f32 %v888_v37  ;;  %2445 = vmatprep.subr.bf16.mxu1 %v2957_v40  ;;  %v980_v49 = vmul.f32 %v948_v36, %v3642_v9  ;;  %2405 = vmatpush1.bf16.msra.mxu0 %v2404_v14  ;;  %v2410_v37 = vpack.c.bf16 %v1423_v46, %v1422_v41 }
 0x2f9   : > { %v2628_v57 = vpop.eup %2627  ;;  %v891_v39 = vadd.f32 1e-05, %v859_v23  ;;  %2406 = vmatprep.subr.bf16.mxu0 %v2957_v40  ;;  %v1426_v23 = vld [vmem:[#allocation8 + $0x70] sm:$0xff] }
 0x2fa   : > { %1238 = vmatmul.mubr.bf16.gmra.mrb[20].mxu1 %v1037_v29  ;;  %v949_v51 = vmul.f32 %v2628_v57, %v3585_v17  ;;  %v2630_v5 = vpop.eup %2629  ;;  %v3783_v17 = vadd.f32 %v980_v49, %v3651_v11  ;;  %v2416_v44 = vpack.c.bf16 %v1427_v7, %v1426_v23  ;;  %v1437_v23 = vld [vmem:[#allocation8 + $0xc8] sm:$0xff] }
 0x2fb   : > { %1247 = vmatprep.mubr.bf16.mxu1 %v2956_v28  ;;  %2461 = vmatpush1.bf16.msra.mxu1 %v2404_v14  ;;  %v950_v59 = vmul.f32 %v2630_v5, %v3594_v55  ;;  %2637 = vrsqrt.f32 %v891_v39  ;;  %v1428_v39 = vld [vmem:[#allocation8 + $0x80] sm:$0xff] }
 0x2fc   : > { %v981_v52 = vmul.f32 %v949_v51, %v3642_v9  ;;  %2446 = vmatprep.subr.bf16.mxu1 %v2957_v40  ;;  %2408 = vmatpush1.bf16.msra.mxu0 %v2407_v8  ;;  %2639 = vrsqrt.f32 %v890_v61  ;;  %v2419_v21 = vpack.c.bf16 %v1429_v50, %v1428_v39  ;;  %v1442_v39 = vld [vmem:[#allocation8 + $0xf0] sm:$0xff]  ;;  %v1443_v50 = vld [vmem:[#allocation8 + $0xf8] sm:$0xff] }
 0x2fd   : > { %v2632_v53 = vpop.eup %2631  ;;  %2409 = vmatprep.subr.bf16.mxu0 %v2957_v40  ;;  %v982_v55 = vmul.f32 %v950_v59, %v3642_v9 }
 0x2fe   : > { %v3786_v38 = vadd.f32 %v981_v52, %v3651_v11  ;;  %v951_v27 = vmul.f32 %v2632_v53, %v3600_v24  ;;  %v1424_v24 = vld [vmem:[#allocation8 + $0x60] sm:$0xff]  ;;  %v1430_v52 = vld [vmem:[#allocation8 + $0x90] sm:$0xff] }
 0x2ff   : > { %2462 = vmatpush1.bf16.msra.mxu1 %v2407_v8  ;;  %v2413_v36 = vpack.c.bf16 %v1425_v32, %v1424_v24  ;;  %v3804_v14 = vadd.f32 %v982_v55, %v3651_v11  ;;  %v1431_v8 = vld [vmem:[#allocation8 + $0x98] sm:$0xff] }
 0x300   : > { %v1038_v60 = vpack.c.bf16 %v3786_v38, %v3783_v17  ;;  %v983_v0 = vmul.f32 %v951_v27, %v3642_v9  ;;  %2447 = vmatprep.subr.bf16.mxu1 %v2957_v40  ;;  %2411 = vmatpush1.bf16.msra.mxu0 %v2410_v37  ;;  %v2422_v41 = vpack.c.bf16 %v1431_v8, %v1430_v52  ;;  %v1435_v55 = vld [vmem:[#allocation8 + $0xb8] sm:$0xff] }
 0x301   : > { %v2634_v63 = vpop.eup %2633  ;;  %2412 = vmatprep.subr.bf16.mxu0 %v2957_v40 }
 0x302   : > { %1248 = vmatmul.mubr.bf16.gmra.mrb[24].mxu1 %v1038_v60  ;;  %v2636_v3 = vpop.eup %2635  ;;  %v3799_v12 = vadd.f32 %v983_v0, %v3651_v11  ;;  %v953_v29 = vmul.f32 %v2634_v63, %v3612_v62  ;;  %v1432_v0 = vld [vmem:[#allocation8 + $0xa0] sm:$0xff]  ;;  %v1434_v63 = vld [vmem:[#allocation8 + $0xb0] sm:$0xff] }
 0x303   : > { %1257 = vmatprep.mubr.bf16.mxu1 %v2956_v28  ;;  %2463 = vmatpush1.bf16.msra.mxu1 %v2410_v37  ;;  %v952_v57 = vmul.f32 %v2636_v3, %v3605_v20  ;;  %v1433_v37 = vld [vmem:[#allocation8 + $0xa8] sm:$0xff]  ;;  %v2428_v3 = vpack.c.bf16 %v1435_v55, %v1434_v63 }
 0x304   : > { %2448 = vmatprep.subr.bf16.mxu1 %v2957_v40  ;;  %2414 = vmatpush1.bf16.msra.mxu0 %v2413_v36  ;;  %v1039_v51 = vpack.c.bf16 %v3799_v12, %v3804_v14  ;;  %v985_v49 = vmul.f32 %v953_v29, %v3642_v9 }
 0x305   : > { %2415 = vmatprep.subr.bf16.mxu0 %v2957_v40  ;;  %v2638_v5 = vpop.eup %2637  ;;  %v984_v62 = vmul.f32 %v952_v57, %v3642_v9  ;;  %v1438_v57 = vld [vmem:[#allocation8 + $0xd0] sm:$0xff] }
 0x306   : > { %v2640_v20 = vpop.eup %2639  ;;  %v3816_v53 = vadd.f32 %v985_v49, %v3651_v11  ;;  %v955_v61 = vmul.f32 %v2638_v5, %v3622_v6  ;;  %v1440_v49 = vld [vmem:[#allocation8 + $0xe0] sm:$0xff]  ;;  %v1441_v5 = vld [vmem:[#allocation8 + $0xe8] sm:$0xff] }
 0x307   : > { %2464 = vmatpush1.bf16.msra.mxu1 %v2413_v36  ;;  %v3821_v59 = vadd.f32 %v984_v62, %v3651_v11  ;;  %v954_v27 = vmul.f32 %v2640_v20, %v3615_v47  ;;  %v2425_v47 = vpack.c.bf16 %v1433_v37, %v1432_v0  ;;  %v1436_v36 = vld [vmem:[#allocation8 + $0xc0] sm:$0xff]  ;;  %v2437_v62 = vpack.c.bf16 %v1441_v5, %v1440_v49 }
 0x308   : > { %2449 = vmatprep.subr.bf16.mxu1 %v2957_v40  ;;  %2417 = vmatpush1.bf16.msra.mxu0 %v2416_v44  ;;  %v987_v60 = vmul.f32 %v955_v61, %v3642_v9  ;;  %v2431_v29 = vpack.c.bf16 %v1437_v23, %v1436_v36  ;;  %v2440_v20 = vpack.c.bf16 %v1443_v50, %v1442_v39 }
 0x309   : > { %2418 = vmatprep.subr.bf16.mxu0 %v2957_v40  ;;  %v1040_v46 = vpack.c.bf16 %v3816_v53, %v3821_v59  ;;  %v986_v6 = vmul.f32 %v954_v27, %v3642_v9 }
 0x30a   : > { %1258 = vmatmul.mubr.bf16.gmra.mrb[28].mxu1 %v1039_v51  ;;  %v3833_v24 = vadd.f32 %v987_v60, %v3651_v11 }
 0x30b   : > { %1267 = vmatprep.mubr.bf16.mxu1 %v2956_v28  ;;  %2465 = vmatpush1.bf16.msra.mxu1 %v2416_v44  ;;  %v3837_v32 = vadd.f32 %v986_v6, %v3651_v11  ;;  %v1439_v44 = vld [vmem:[#allocation8 + $0xd8] sm:$0xff] }
 0x30c   : > { %2450 = vmatprep.subr.bf16.mxu1 %v2957_v40  ;;  %2420 = vmatpush1.bf16.msra.mxu0 %v2419_v21  ;;  %v2434_v51 = vpack.c.bf16 %v1439_v44, %v1438_v57 }
 0x30d   : > { %2421 = vmatprep.subr.bf16.mxu0 %v2957_v40  ;;  %v1041_v7 = vpack.c.bf16 %v3833_v24, %v3837_v32 }
 0x30f   : > { %2466 = vmatpush1.bf16.msra.mxu1 %v2419_v21 }
 0x310   : > { %2451 = vmatprep.subr.bf16.mxu1 %v2957_v40  ;;  %2423 = vmatpush1.bf16.msra.mxu0 %v2422_v41 }
 0x311   : > { %2424 = vmatprep.subr.bf16.mxu0 %v2957_v40 }
 0x312   : > { %1268 = vmatmul.mubr.bf16.gmra.mrb[32].mxu1 %v1040_v46 }
 0x313   : > { %1277 = vmatprep.mubr.bf16.mxu1 %v2956_v28  ;;  %2467 = vmatpush1.bf16.msra.mxu1 %v2422_v41 }
 0x314   : > { %2452 = vmatprep.subr.bf16.mxu1 %v2957_v40  ;;  %2426 = vmatpush1.bf16.msra.mxu0 %v2425_v47 }
 0x315   : > { %2427 = vmatprep.subr.bf16.mxu0 %v2957_v40 }
 0x317   : > { %2468 = vmatpush1.bf16.msra.mxu1 %v2425_v47 }
 0x318   : > { %2453 = vmatprep.subr.bf16.mxu1 %v2957_v40  ;;  %2429 = vmatpush1.bf16.msra.mxu0 %v2428_v3 }
 0x319   : > { %2430 = vmatprep.subr.bf16.mxu0 %v2957_v40 }
 0x31a   : > { %1278 = vmatmul.mubr.bf16.gmra.mrb[36].mxu1 %v1041_v7 }
 0x31b   : > { %1287 = vmatprep.mubr.bf16.mxu1 %v2956_v28  ;;  %2469 = vmatpush1.bf16.msra.mxu1 %v2428_v3 }
 0x31c   : > { %2454 = vmatprep.subr.bf16.mxu1 %v2957_v40  ;;  %2432 = vmatpush1.bf16.msra.mxu0 %v2431_v29 }
 0x31d   : > { %2433 = vmatprep.subr.bf16.mxu0 %v2957_v40 }
 0x31f   : > { %2470 = vmatpush1.bf16.msra.mxu1 %v2431_v29 }
 0x320   : > { %2455 = vmatprep.subr.bf16.mxu1 %v2957_v40  ;;  %2435 = vmatpush1.bf16.msra.mxu0 %v2434_v51 }
 0x321   : > { %2436 = vmatprep.subr.bf16.mxu0 %v2957_v40 }
 0x323   : > { %2471 = vmatpush1.bf16.msra.mxu1 %v2434_v51 }
 0x324   : > { %2456 = vmatprep.subr.bf16.mxu1 %v2957_v40  ;;  %2438 = vmatpush1.bf16.msra.mxu0 %v2437_v62 }
 0x325   : > { %2439 = vmatprep.subr.bf16.mxu0 %v2957_v40 }
 0x327   : > { %2472 = vmatpush1.bf16.msra.mxu1 %v2437_v62 }
 0x328   : > { %2457 = vmatprep.subr.bf16.mxu1 %v2957_v40  ;;  %2441 = vmatpush1.bf16.msra.mxu0 %v2440_v20 }
 0x32b   : > { %2473 = vmatpush1.bf16.msra.mxu1 %v2440_v20 }
 0x34e   : > { %v817_v21 = vpop.xlane.xlu0 %816 }
 0x34f   : > { %v860_v52 = vmul.f32 0.0078125, %v817_v21 }
 0x351   : > { %v892_v8 = vadd.f32 1e-05, %v860_v52 }
 0x352   : > { %v819_v61 = vpop.xlane.xlu1 %818 }
 0x353   : > { %2641 = vrsqrt.f32 %v892_v8  ;;  %v861_v27 = vmul.f32 0.0078125, %v819_v61 }
 0x355   : > { %v893_v41 = vadd.f32 1e-05, %v861_v27 }
 0x356   : > { %v821_v46 = vpop.xlane.xlu0 %820 }
 0x357   : > { %2643 = vrsqrt.f32 %v893_v41  ;;  %v862_v60 = vmul.f32 0.0078125, %v821_v46 }
 0x359   : > { %v894_v6 = vadd.f32 1e-05, %v862_v60 }
 0x35a   : > { %v823_v0 = vpop.xlane.xlu1 %822 }
 0x35b   : > { %2645 = vrsqrt.f32 %v894_v6  ;;  %v863_v37 = vmul.f32 0.0078125, %v823_v0 }
 0x35d   : > { %v2642_v47 = vpop.eup %2641  ;;  %v895_v63 = vadd.f32 1e-05, %v863_v37 }
 0x35e   : > { %v825_v55 = vpop.xlane.xlu0 %824  ;;  %v956_v40 = vmul.f32 %v2642_v47, %v3627_v42 }
 0x35f   : > { %2647 = vrsqrt.f32 %v895_v63  ;;  %v864_v3 = vmul.f32 0.0078125, %v825_v55 }
 0x360   : > { %v988_v57 = vmul.f32 %v956_v40, %v3642_v9 }
 0x361   : > { %v2644_v36 = vpop.eup %2643  ;;  %v896_v23 = vadd.f32 1e-05, %v864_v3 }
 0x362   : > { %v827_v7 = vpop.xlane.xlu1 %826  ;;  %v957_v29 = vmul.f32 %v2644_v36, %v3632_v56  ;;  %v3857_v39 = vadd.f32 %v988_v57, %v3651_v11 }
 0x363   : > { %2649 = vrsqrt.f32 %v896_v23  ;;  %v865_v44 = vmul.f32 0.0078125, %v827_v7 }
 0x364   : > { %v989_v51 = vmul.f32 %v957_v29, %v3642_v9 }
 0x365   : > { %v2646_v49 = vpop.eup %2645  ;;  %v897_v5 = vadd.f32 1e-05, %v865_v44 }
 0x366   : > { %v829_v62 = vpop.xlane.xlu0 %828  ;;  %v3860_v42 = vadd.f32 %v989_v51, %v3651_v11  ;;  %v958_v50 = vmul.f32 %v2646_v49, %v3637_v31 }
 0x367   : > { %2651 = vrsqrt.f32 %v897_v5  ;;  %v866_v20 = vmul.f32 0.0078125, %v829_v62 }
 0x368   : > { %v1042_v56 = vpack.c.bf16 %v3860_v42, %v3857_v39  ;;  %v990_v27 = vmul.f32 %v958_v50, %v3642_v9 }
 0x369   : > { %v2648_v21 = vpop.eup %2647  ;;  %v898_v52 = vadd.f32 1e-05, %v866_v20 }
 0x36a   : > { %v831_v8 = vpop.xlane.xlu1 %830  ;;  %1288 = vmatmul.mubr.bf16.gmra.mrb[40].mxu1 %v1042_v56  ;;  %v959_v61 = vmul.f32 %v2648_v21, %v3645_v15  ;;  %v3870_v0 = vadd.f32 %v990_v27, %v3651_v11 }
 0x36b   : > { %2653 = vrsqrt.f32 %v898_v52  ;;  %v867_v41 = vmul.f32 0.0078125, %v831_v8  ;;  %1297 = vmatprep.mubr.bf16.mxu1 %v2956_v28 }
 0x36c   : > { %v991_v46 = vmul.f32 %v959_v61, %v3642_v9 }
 0x36d   : > { %v2650_v31 = vpop.eup %2649  ;;  %v899_v60 = vadd.f32 1e-05, %v867_v41 }
 0x36e   : > { %v833_v6 = vpop.xlane.xlu0 %832  ;;  %v3873_v37 = vadd.f32 %v991_v46, %v3651_v11  ;;  %v960_v47 = vmul.f32 %v2650_v31, %v3655_v35 }
 0x36f   : > { %2655 = vrsqrt.f32 %v899_v60  ;;  %v868_v15 = vmul.f32 0.0078125, %v833_v6 }
 0x370   : > { %v1043_v63 = vpack.c.bf16 %v3873_v37, %v3870_v0  ;;  %v992_v23 = vmul.f32 %v960_v47, %v3642_v9 }
 0x371   : > { %v2652_v55 = vpop.eup %2651  ;;  %v900_v40 = vadd.f32 1e-05, %v868_v15 }
 0x372   : > { %v835_v3 = vpop.xlane.xlu1 %834  ;;  %1298 = vmatmul.mubr.bf16.gmra.mrb[44].mxu1 %v1043_v63  ;;  %v961_v36 = vmul.f32 %v2652_v55, %v3669_v33  ;;  %v3883_v51 = vadd.f32 %v992_v23, %v3651_v11 }
 0x373   : > { %2657 = vrsqrt.f32 %v900_v40  ;;  %v869_v7 = vmul.f32 0.0078125, %v835_v3  ;;  %1307 = vmatprep.mubr.bf16.mxu1 %v2956_v28 }
 0x374   : > { %v993_v29 = vmul.f32 %v961_v36, %v3642_v9 }
 0x375   : > { %v2654_v35 = vpop.eup %2653  ;;  %v901_v57 = vadd.f32 1e-05, %v869_v7 }
 0x376   : > { %v837_v44 = vpop.xlane.xlu0 %836  ;;  %v3886_v49 = vadd.f32 %v993_v29, %v3651_v11  ;;  %v962_v5 = vmul.f32 %v2654_v35, %v3678_v30 }
 0x377   : > { %2659 = vrsqrt.f32 %v901_v57  ;;  %v870_v33 = vmul.f32 0.0078125, %v837_v44  ;;  %v1065_v57 = vlaneseq }
 0x378   : > { %v1044_v62 = vpack.c.bf16 %v3886_v49, %v3883_v51  ;;  %v994_v52 = vmul.f32 %v962_v5, %v3642_v9 }
 0x379   : > { %v2656_v50 = vpop.eup %2655  ;;  %v902_v20 = vadd.f32 1e-05, %v870_v33  ;;  %v1066_v44 = vshrl.u32 %v1065_v57, 7 }
 0x37a   : > { %v839_v56 = vpop.xlane.xlu1 %838  ;;  %1308 = vmatmul.mubr.bf16.gmra.mrb[48].mxu1 %v1044_v62  ;;  %v963_v21 = vmul.f32 %v2656_v50, %v3692_v4  ;;  %v3896_v41 = vadd.f32 %v994_v52, %v3651_v11 }
 0x37b   : > { %2661 = vrsqrt.f32 %v902_v20  ;;  %v871_v8 = vmul.f32 0.0078125, %v839_v56  ;;  %1317 = vmatprep.mubr.bf16.mxu1 %v2956_v28  ;;  %v1067_v5 = vsub.s32 0, %v1066_v44  ;;  %v1071_v33 = vsub.s32 1, %v1066_v44 }
 0x37c   : > { %v995_v61 = vmul.f32 %v963_v21, %v3642_v9 }
 0x37d   : > { %v2658_v30 = vpop.eup %2657  ;;  %v903_v27 = vadd.f32 1e-05, %v871_v8 }
 0x37e   : > { %v3899_v46 = vadd.f32 %v995_v61, %v3651_v11  ;;  %v964_v31 = vmul.f32 %v2658_v30, %v3701_v58 }
 0x37f   : > { %2663 = vrsqrt.f32 %v903_v27 }
 0x380   : > { %v1045_v4 = vpack.c.bf16 %v3899_v46, %v3896_v41  ;;  %v996_v47 = vmul.f32 %v964_v31, %v3642_v9 }
 0x381   : > { %v2660_v60 = vpop.eup %2659 }
 0x382   : > { %1318 = vmatmul.mubr.bf16.gmra.mrb[52].mxu1 %v1045_v4  ;;  %v965_v6 = vmul.f32 %v2660_v60, %v3715_v25  ;;  %v3909_v55 = vadd.f32 %v996_v47, %v3651_v11 }
 0x383   : > { %1327 = vmatprep.mubr.bf16.mxu1 %v2956_v28 }
 0x384   : > { %v997_v15 = vmul.f32 %v965_v6, %v3642_v9 }
 0x385   : > { %v2662_v63 = vpop.eup %2661 }
 0x386   : > { %v3912_v58 = vadd.f32 %v997_v15, %v3651_v11  ;;  %v966_v40 = vmul.f32 %v2662_v63, %v3724_v45 }
 0x388   : > { %v1046_v3 = vpack.c.bf16 %v3912_v58, %v3909_v55  ;;  %v998_v23 = vmul.f32 %v966_v40, %v3642_v9 }
 0x389   : > { %v2664_v36 = vpop.eup %2663 }
 0x38a   : > { %1328 = vmatmul.mubr.bf16.gmra.mrb[56].mxu1 %v1046_v3  ;;  %v967_v25 = vmul.f32 %v2664_v36, %v3738_v16  ;;  %v3922_v29 = vadd.f32 %v998_v23, %v3651_v11  ;;  %v354_v16 = vld [vmem:[#allocation10 + $0x3] ss:$8 sm:$0x3] }
 0x38b   : > { %1337 = vmatprep.mubr.bf16.mxu1 %v2956_v28  ;;  %v3929_v62 = vrot.slane %v354_v16, %v1067_v5  ;;  %v3931_v28 = vrot.slane %v354_v16, %v1071_v33 }
 0x38c   : > { %v999_v7 = vmul.f32 %v967_v25, %v3642_v9 }
 0x38e   : > { %v3925_v35 = vadd.f32 %v999_v7, %v3651_v11 }
 0x390   : > { %v1047_v45 = vpack.c.bf16 %v3925_v35, %v3922_v29 }
 0x392   : > { %1338 = vmatmul.mubr.bf16.gmra.mrb[60].mxu1 %v1047_v45 }
 0x3a5   : > { %v1189_v9 = vpop.f32.mrb[0].mxu1 }
 0x3a6   : > { %v1190_v50 = vadd.f32 %v1189_v9, %v3929_v62  ;;  %v1191_v20 = vpop.f32.mrb[1].mxu1 }
 0x3a7   : > { %v1192_v11 = vadd.f32 %v1191_v20, %v3931_v28  ;;  %v1193_v56 = vpop.f32.mrb[2].mxu1 }
 0x3a8   : > { %v1195_v21 = vpop.f32.mrb[3].mxu1  ;;  %v1348_v61 = vmax.f32 %v1190_v50, 0.0  ;;  %v1194_v30 = vadd.f32 %v1193_v56, %v3929_v62 }
 0x3a9   : > { %v1349_v52 = vmax.f32 %v1192_v11, 0.0  ;;  %v1196_v8 = vadd.f32 %v1195_v21, %v3931_v28 }
 0x3aa   : > { %v1350_v4 = vmax.f32 %v1194_v30, 0.0 }
 0x3ab   : > { %v1351_v27 = vmax.f32 %v1196_v8, 0.0  ;;  %1508 = vmatprep.mubr.f32.mxu0 %v1349_v52 }
 0x3ac   : > { %1509 = vmatmul.mubr.f32.vlgmr.msra.gmra.mrb[32].mxu0 %v1348_v61 }
 0x3ad   : > { %v1199_v31 = vpop.f32.mrb[4].mxu1  ;;  %1513 = vmatprep.mubr.f32.mxu0 %v1351_v27 }
 0x3ae   : > { %v1200_v60 = vadd.f32 %v1199_v31, %v3929_v62  ;;  %v1201_v6 = vpop.f32.mrb[5].mxu1 }
 0x3af   : > { %v1202_v47 = vadd.f32 %v1201_v6, %v3931_v28  ;;  %v1203_v15 = vpop.f32.mrb[6].mxu1 }
 0x3b0   : > { %v1205_v63 = vpop.f32.mrb[7].mxu1  ;;  %1514 = vmatmul.mubr.f32.gmra.mrb[34].mxu0 %v1350_v4  ;;  %v1352_v36 = vmax.f32 %v1200_v60, 0.0  ;;  %v1204_v25 = vadd.f32 %v1203_v15, %v3929_v62 }
 0x3b1   : > { %v1353_v40 = vmax.f32 %v1202_v47, 0.0  ;;  %v1206_v3 = vadd.f32 %v1205_v63, %v3931_v28 }
 0x3b2   : > { %v1354_v45 = vmax.f32 %v1204_v25, 0.0 }
 0x3b3   : > { %v1355_v23 = vmax.f32 %v1206_v3, 0.0  ;;  %1518 = vmatprep.mubr.f32.mxu0 %v1353_v40 }
 0x3b4   : > { %1519 = vmatmul.mubr.f32.gmra.mrb[36].mxu0 %v1352_v36 }
 0x3b5   : > { %v1209_v7 = vpop.f32.mrb[8].mxu1  ;;  %1523 = vmatprep.mubr.f32.mxu0 %v1355_v23 }
 0x3b6   : > { %v1210_v57 = vadd.f32 %v1209_v7, %v3929_v62  ;;  %v1211_v44 = vpop.f32.mrb[9].mxu1 }
 0x3b7   : > { %v1212_v5 = vadd.f32 %v1211_v44, %v3931_v28  ;;  %v1213_v16 = vpop.f32.mrb[10].mxu1 }
 0x3b8   : > { %v1215_v33 = vpop.f32.mrb[11].mxu1  ;;  %1524 = vmatmul.mubr.f32.gmra.mrb[38].mxu0 %v1354_v45  ;;  %v1356_v20 = vmax.f32 %v1210_v57, 0.0  ;;  %v1214_v11 = vadd.f32 %v1213_v16, %v3929_v62 }
 0x3b9   : > { %v1357_v9 = vmax.f32 %v1212_v5, 0.0  ;;  %v1216_v50 = vadd.f32 %v1215_v33, %v3931_v28 }
 0x3ba   : > { %v1358_v52 = vmax.f32 %v1214_v11, 0.0 }
 0x3bb   : > { %v1359_v56 = vmax.f32 %v1216_v50, 0.0  ;;  %1528 = vmatprep.mubr.f32.mxu0 %v1357_v9 }
 0x3bc   : > { %1529 = vmatmul.mubr.f32.gmra.mrb[40].mxu0 %v1356_v20 }
 0x3bd   : > { %v1219_v21 = vpop.f32.mrb[12].mxu1  ;;  %1533 = vmatprep.mubr.f32.mxu0 %v1359_v56 }
 0x3be   : > { %v1220_v8 = vadd.f32 %v1219_v21, %v3929_v62  ;;  %v1221_v61 = vpop.f32.mrb[13].mxu1 }
 0x3bf   : > { %v1222_v30 = vadd.f32 %v1221_v61, %v3931_v28  ;;  %v1223_v27 = vpop.f32.mrb[14].mxu1 }
 0x3c0   : > { %v1225_v31 = vpop.f32.mrb[15].mxu1  ;;  %1534 = vmatmul.mubr.f32.gmra.mrb[42].mxu0 %v1358_v52  ;;  %v1360_v6 = vmax.f32 %v1220_v8, 0.0  ;;  %v1224_v47 = vadd.f32 %v1223_v27, %v3929_v62 }
 0x3c1   : > { %v1361_v4 = vmax.f32 %v1222_v30, 0.0  ;;  %v1226_v60 = vadd.f32 %v1225_v31, %v3931_v28 }
 0x3c2   : > { %v1362_v40 = vmax.f32 %v1224_v47, 0.0 }
 0x3c3   : > { %v1363_v15 = vmax.f32 %v1226_v60, 0.0  ;;  %1538 = vmatprep.mubr.f32.mxu0 %v1361_v4 }
 0x3c4   : > { %1539 = vmatmul.mubr.f32.gmra.mrb[44].mxu0 %v1360_v6 }
 0x3c5   : > { %v1229_v63 = vpop.f32.mrb[16].mxu1  ;;  %1543 = vmatprep.mubr.f32.mxu0 %v1363_v15 }
 0x3c6   : > { %v1230_v3 = vadd.f32 %v1229_v63, %v3929_v62  ;;  %v1231_v36 = vpop.f32.mrb[17].mxu1 }
 0x3c7   : > { %v1232_v25 = vadd.f32 %v1231_v36, %v3931_v28  ;;  %v1233_v23 = vpop.f32.mrb[18].mxu1 }
 0x3c8   : > { %v1235_v7 = vpop.f32.mrb[19].mxu1  ;;  %1544 = vmatmul.mubr.f32.gmra.mrb[46].mxu0 %v1362_v40  ;;  %v1364_v44 = vmax.f32 %v1230_v3, 0.0  ;;  %v1234_v5 = vadd.f32 %v1233_v23, %v3929_v62 }
 0x3c9   : > { %v1365_v45 = vmax.f32 %v1232_v25, 0.0  ;;  %v1236_v57 = vadd.f32 %v1235_v7, %v3931_v28 }
 0x3ca   : > { %v1366_v9 = vmax.f32 %v1234_v5, 0.0 }
 0x3cb   : > { %v1367_v16 = vmax.f32 %v1236_v57, 0.0  ;;  %1548 = vmatprep.mubr.f32.mxu0 %v1365_v45 }
 0x3cc   : > { %1549 = vmatmul.mubr.f32.gmra.mrb[48].mxu0 %v1364_v44 }
 0x3cd   : > { %v1239_v33 = vpop.f32.mrb[20].mxu1  ;;  %1553 = vmatprep.mubr.f32.mxu0 %v1367_v16 }
 0x3ce   : > { %v1240_v50 = vadd.f32 %v1239_v33, %v3929_v62  ;;  %v1241_v20 = vpop.f32.mrb[21].mxu1 }
 0x3cf   : > { %v1242_v11 = vadd.f32 %v1241_v20, %v3931_v28  ;;  %v1243_v56 = vpop.f32.mrb[22].mxu1 }
 0x3d0   : > { %v1245_v21 = vpop.f32.mrb[23].mxu1  ;;  %1554 = vmatmul.mubr.f32.gmra.mrb[50].mxu0 %v1366_v9  ;;  %v1368_v61 = vmax.f32 %v1240_v50, 0.0  ;;  %v1244_v30 = vadd.f32 %v1243_v56, %v3929_v62 }
 0x3d1   : > { %v1369_v52 = vmax.f32 %v1242_v11, 0.0  ;;  %v1246_v8 = vadd.f32 %v1245_v21, %v3931_v28 }
 0x3d2   : > { %v1370_v4 = vmax.f32 %v1244_v30, 0.0 }
 0x3d3   : > { %v1371_v27 = vmax.f32 %v1246_v8, 0.0  ;;  %1558 = vmatprep.mubr.f32.mxu0 %v1369_v52 }
 0x3d4   : > { %1559 = vmatmul.mubr.f32.gmra.mrb[52].mxu0 %v1368_v61 }
 0x3d5   : > { %v1249_v31 = vpop.f32.mrb[24].mxu1  ;;  %1563 = vmatprep.mubr.f32.mxu0 %v1371_v27 }
 0x3d6   : > { %v1250_v60 = vadd.f32 %v1249_v31, %v3929_v62  ;;  %v1251_v6 = vpop.f32.mrb[25].mxu1 }
 0x3d7   : > { %v1252_v47 = vadd.f32 %v1251_v6, %v3931_v28  ;;  %v1253_v15 = vpop.f32.mrb[26].mxu1 }
 0x3d8   : > { %v1255_v63 = vpop.f32.mrb[27].mxu1  ;;  %1564 = vmatmul.mubr.f32.gmra.mrb[54].mxu0 %v1370_v4  ;;  %v1372_v36 = vmax.f32 %v1250_v60, 0.0  ;;  %v1254_v25 = vadd.f32 %v1253_v15, %v3929_v62 }
 0x3d9   : > { %v1373_v40 = vmax.f32 %v1252_v47, 0.0  ;;  %v1256_v3 = vadd.f32 %v1255_v63, %v3931_v28 }
 0x3da   : > { %v1374_v45 = vmax.f32 %v1254_v25, 0.0 }
 0x3db   : > { %v1375_v23 = vmax.f32 %v1256_v3, 0.0  ;;  %1568 = vmatprep.mubr.f32.mxu0 %v1373_v40 }
 0x3dc   : > { %1569 = vmatmul.mubr.f32.gmra.mrb[56].mxu0 %v1372_v36 }
 0x3dd   : > { %v1259_v7 = vpop.f32.mrb[28].mxu1  ;;  %1573 = vmatprep.mubr.f32.mxu0 %v1375_v23 }
 0x3de   : > { %v1260_v57 = vadd.f32 %v1259_v7, %v3929_v62  ;;  %v1261_v44 = vpop.f32.mrb[29].mxu1 }
 0x3df   : > { %v1262_v5 = vadd.f32 %v1261_v44, %v3931_v28  ;;  %v1263_v16 = vpop.f32.mrb[30].mxu1 }
 0x3e0   : > { %v1265_v33 = vpop.f32.mrb[31].mxu1  ;;  %1574 = vmatmul.mubr.f32.gmra.mrb[58].mxu0 %v1374_v45  ;;  %v1376_v20 = vmax.f32 %v1260_v57, 0.0  ;;  %v1264_v11 = vadd.f32 %v1263_v16, %v3929_v62 }
 0x3e1   : > { %v1377_v9 = vmax.f32 %v1262_v5, 0.0  ;;  %v1266_v50 = vadd.f32 %v1265_v33, %v3931_v28 }
 0x3e2   : > { %v1378_v52 = vmax.f32 %v1264_v11, 0.0 }
 0x3e3   : > { %v1379_v56 = vmax.f32 %v1266_v50, 0.0  ;;  %1578 = vmatprep.mubr.f32.mxu0 %v1377_v9 }
 0x3e4   : > { %1579 = vmatmul.mubr.f32.gmra.mrb[60].mxu0 %v1376_v20 }
 0x3e5   : > { %v1269_v21 = vpop.f32.mrb[32].mxu1  ;;  %1583 = vmatprep.mubr.f32.mxu0 %v1379_v56 }
 0x3e6   : > { %v1270_v8 = vadd.f32 %v1269_v21, %v3929_v62  ;;  %v1271_v61 = vpop.f32.mrb[33].mxu1 }
 0x3e7   : > { %v1272_v30 = vadd.f32 %v1271_v61, %v3931_v28  ;;  %v1273_v27 = vpop.f32.mrb[34].mxu1 }
 0x3e8   : > { %v1275_v31 = vpop.f32.mrb[35].mxu1  ;;  %1584 = vmatmul.mubr.f32.gmra.mrb[62].mxu0 %v1378_v52  ;;  %v1380_v6 = vmax.f32 %v1270_v8, 0.0  ;;  %v1274_v47 = vadd.f32 %v1273_v27, %v3929_v62 }
 0x3e9   : > { %v1381_v4 = vmax.f32 %v1272_v30, 0.0  ;;  %v1276_v60 = vadd.f32 %v1275_v31, %v3931_v28 }
 0x3ea   : > { %v1382_v40 = vmax.f32 %v1274_v47, 0.0 }
 0x3eb   : > { %v1383_v15 = vmax.f32 %v1276_v60, 0.0  ;;  %1588 = vmatprep.mubr.f32.mxu0 %v1381_v4 }
 0x3ec   : > { %1589 = vmatmul.mubr.f32.gmra.mrb[64].mxu0 %v1380_v6 }
 0x3ed   : > { %v1279_v63 = vpop.f32.mrb[36].mxu1  ;;  %1593 = vmatprep.mubr.f32.mxu0 %v1383_v15 }
 0x3ee   : > { %v1280_v3 = vadd.f32 %v1279_v63, %v3929_v62  ;;  %v1281_v36 = vpop.f32.mrb[37].mxu1 }
 0x3ef   : > { %v1282_v25 = vadd.f32 %v1281_v36, %v3931_v28  ;;  %v1283_v23 = vpop.f32.mrb[38].mxu1 }
 0x3f0   : > { %v1285_v7 = vpop.f32.mrb[39].mxu1  ;;  %1594 = vmatmul.mubr.f32.gmra.mrb[66].mxu0 %v1382_v40  ;;  %v1384_v44 = vmax.f32 %v1280_v3, 0.0  ;;  %v1284_v5 = vadd.f32 %v1283_v23, %v3929_v62 }
 0x3f1   : > { %v1385_v45 = vmax.f32 %v1282_v25, 0.0  ;;  %v1286_v57 = vadd.f32 %v1285_v7, %v3931_v28 }
 0x3f2   : > { %v1386_v33 = vmax.f32 %v1284_v5, 0.0 }
 0x3f3   : > { %v1387_v16 = vmax.f32 %v1286_v57, 0.0  ;;  %1598 = vmatprep.mubr.f32.mxu0 %v1385_v45 }
 0x3f4   : > { %1599 = vmatmul.mubr.f32.gmra.mrb[68].mxu0 %v1384_v44 }
 0x3f5   : > { %1603 = vmatprep.mubr.f32.mxu0 %v1387_v16 }
 0x3f8   : > { %1604 = vmatmul.mubr.f32.gmra.mrb[70].mxu0 %v1386_v33 }
 0x43d   : > { %v1289_v9 = vpop.f32.mrb[40].mxu1 }
 0x43e   : > { %v1290_v50 = vadd.f32 %v1289_v9, %v3929_v62  ;;  %v1291_v20 = vpop.f32.mrb[41].mxu1 }
 0x43f   : > { %v1292_v11 = vadd.f32 %v1291_v20, %v3931_v28  ;;  %v1293_v56 = vpop.f32.mrb[42].mxu1 }
 0x440   : > { %v1295_v21 = vpop.f32.mrb[43].mxu1  ;;  %v1388_v61 = vmax.f32 %v1290_v50, 0.0  ;;  %v1294_v30 = vadd.f32 %v1293_v56, %v3929_v62 }
 0x441   : > { %v1389_v52 = vmax.f32 %v1292_v11, 0.0  ;;  %v1296_v8 = vadd.f32 %v1295_v21, %v3931_v28 }
 0x442   : > { %v1390_v4 = vmax.f32 %v1294_v30, 0.0 }
 0x443   : > { %v1391_v27 = vmax.f32 %v1296_v8, 0.0  ;;  %1608 = vmatprep.mubr.f32.mxu0 %v1389_v52 }
 0x444   : > { %1609 = vmatmul.mubr.f32.gmra.mrb[72].mxu0 %v1388_v61 }
 0x445   : > { %v1299_v31 = vpop.f32.mrb[44].mxu1  ;;  %1613 = vmatprep.mubr.f32.mxu0 %v1391_v27 }
 0x446   : > { %v1300_v60 = vadd.f32 %v1299_v31, %v3929_v62  ;;  %v1301_v6 = vpop.f32.mrb[45].mxu1 }
 0x447   : > { %v1302_v47 = vadd.f32 %v1301_v6, %v3931_v28  ;;  %v1303_v15 = vpop.f32.mrb[46].mxu1 }
 0x448   : > { %v1305_v63 = vpop.f32.mrb[47].mxu1  ;;  %1614 = vmatmul.mubr.f32.gmra.mrb[74].mxu0 %v1390_v4  ;;  %v1392_v36 = vmax.f32 %v1300_v60, 0.0  ;;  %v1304_v25 = vadd.f32 %v1303_v15, %v3929_v62 }
 0x449   : > { %v1393_v40 = vmax.f32 %v1302_v47, 0.0  ;;  %v1306_v3 = vadd.f32 %v1305_v63, %v3931_v28 }
 0x44a   : > { %v1394_v45 = vmax.f32 %v1304_v25, 0.0 }
 0x44b   : > { %v1395_v23 = vmax.f32 %v1306_v3, 0.0  ;;  %1618 = vmatprep.mubr.f32.mxu0 %v1393_v40 }
 0x44c   : > { %1619 = vmatmul.mubr.f32.gmra.mrb[76].mxu0 %v1392_v36 }
 0x44d   : > { %v1309_v7 = vpop.f32.mrb[48].mxu1  ;;  %1623 = vmatprep.mubr.f32.mxu0 %v1395_v23 }
 0x44e   : > { %v1310_v57 = vadd.f32 %v1309_v7, %v3929_v62  ;;  %v1311_v44 = vpop.f32.mrb[49].mxu1 }
 0x44f   : > { %v1312_v5 = vadd.f32 %v1311_v44, %v3931_v28  ;;  %v1313_v16 = vpop.f32.mrb[50].mxu1 }
 0x450   : > { %v1315_v33 = vpop.f32.mrb[51].mxu1  ;;  %1624 = vmatmul.mubr.f32.gmra.mrb[78].mxu0 %v1394_v45  ;;  %v1396_v20 = vmax.f32 %v1310_v57, 0.0  ;;  %v1314_v11 = vadd.f32 %v1313_v16, %v3929_v62 }
 0x451   : > { %v1397_v9 = vmax.f32 %v1312_v5, 0.0  ;;  %v1316_v50 = vadd.f32 %v1315_v33, %v3931_v28 }
 0x452   : > { %v1398_v52 = vmax.f32 %v1314_v11, 0.0 }
 0x453   : > { %v1399_v56 = vmax.f32 %v1316_v50, 0.0  ;;  %1628 = vmatprep.mubr.f32.mxu1 %v1397_v9 }
 0x454   : > { %1629 = vmatmul.mubr.f32.vlgmr.msra.gmra.mrb[64].mxu1 %v1396_v20 }
 0x455   : > { %v1319_v21 = vpop.f32.mrb[52].mxu1  ;;  %1633 = vmatprep.mubr.f32.mxu1 %v1399_v56 }
 0x456   : > { %v1320_v8 = vadd.f32 %v1319_v21, %v3929_v62  ;;  %v1321_v61 = vpop.f32.mrb[53].mxu1 }
 0x457   : > { %v1322_v30 = vadd.f32 %v1321_v61, %v3931_v28  ;;  %v1323_v27 = vpop.f32.mrb[54].mxu1 }
 0x458   : > { %v1325_v31 = vpop.f32.mrb[55].mxu1  ;;  %1634 = vmatmul.mubr.f32.gmra.mrb[66].mxu1 %v1398_v52  ;;  %v1400_v6 = vmax.f32 %v1320_v8, 0.0  ;;  %v1324_v47 = vadd.f32 %v1323_v27, %v3929_v62 }
 0x459   : > { %v1401_v4 = vmax.f32 %v1322_v30, 0.0  ;;  %v1326_v60 = vadd.f32 %v1325_v31, %v3931_v28 }
 0x45a   : > { %v1402_v40 = vmax.f32 %v1324_v47, 0.0 }
 0x45b   : > { %v1403_v15 = vmax.f32 %v1326_v60, 0.0  ;;  %1638 = vmatprep.mubr.f32.mxu1 %v1401_v4  ;;  %v3997_v4 = vld [vmem:[#allocation10 + $0x4] ss:$0 sm:$0xff] }
 0x45c   : > { %1639 = vmatmul.mubr.f32.gmra.mrb[68].mxu1 %v1400_v6 }
 0x45d   : > { %v1329_v63 = vpop.f32.mrb[56].mxu1  ;;  %1643 = vmatprep.mubr.f32.mxu1 %v1403_v15 }
 0x45e   : > { %v1330_v3 = vadd.f32 %v1329_v63, %v3929_v62  ;;  %v1331_v36 = vpop.f32.mrb[57].mxu1 }
 0x45f   : > { %v1332_v25 = vadd.f32 %v1331_v36, %v3931_v28  ;;  %v1333_v23 = vpop.f32.mrb[58].mxu1 }
 0x460   : > { %v1335_v7 = vpop.f32.mrb[59].mxu1  ;;  %1644 = vmatmul.mubr.f32.gmra.mrb[70].mxu1 %v1402_v40  ;;  %v1404_v44 = vmax.f32 %v1330_v3, 0.0  ;;  %v1334_v5 = vadd.f32 %v1333_v23, %v3929_v62 }
 0x461   : > { %v1405_v45 = vmax.f32 %v1332_v25, 0.0  ;;  %v1336_v57 = vadd.f32 %v1335_v7, %v3931_v28 }
 0x462   : > { %v1406_v9 = vmax.f32 %v1334_v5, 0.0 }
 0x463   : > { %v1407_v16 = vmax.f32 %v1336_v57, 0.0  ;;  %1648 = vmatprep.mubr.f32.mxu1 %v1405_v45 }
 0x464   : > { %1649 = vmatmul.mubr.f32.gmra.mrb[72].mxu1 %v1404_v44 }
 0x465   : > { %v1339_v33 = vpop.f32.mrb[60].mxu1  ;;  %1653 = vmatprep.mubr.f32.mxu1 %v1407_v16 }
 0x466   : > { %v1340_v50 = vadd.f32 %v1339_v33, %v3929_v62  ;;  %v1341_v20 = vpop.f32.mrb[61].mxu1 }
 0x467   : > { %v1342_v11 = vadd.f32 %v1341_v20, %v3931_v28  ;;  %v1343_v56 = vpop.f32.mrb[62].mxu1 }
 0x468   : > { %v1345_v21 = vpop.f32.mrb[63].mxu1  ;;  %1654 = vmatmul.mubr.f32.gmra.mrb[74].mxu1 %v1406_v9  ;;  %v1408_v61 = vmax.f32 %v1340_v50, 0.0  ;;  %v1344_v30 = vadd.f32 %v1343_v56, %v3929_v62 }
 0x469   : > { %v1409_v52 = vmax.f32 %v1342_v11, 0.0  ;;  %v1346_v8 = vadd.f32 %v1345_v21, %v3931_v28 }
 0x46a   : > { %v1410_v31 = vmax.f32 %v1344_v30, 0.0 }
 0x46b   : > { %v1411_v27 = vmax.f32 %v1346_v8, 0.0  ;;  %1658 = vmatprep.mubr.f32.mxu1 %v1409_v52 }
 0x46c   : > { %1659 = vmatmul.mubr.f32.gmra.mrb[76].mxu1 %v1408_v61 }
 0x46d   : > { %1663 = vmatprep.mubr.f32.mxu1 %v1411_v27 }
 0x470   : > { %1664 = vmatmul.mubr.f32.gmra.mrb[78].mxu1 %v1410_v31 }
 0x47f   : > { %v1510_v60 = vpop.f32.mrb[32].mxu0 }
 0x480   : > { %v1511_v6 = vadd.f32 %v1510_v60, %v3997_v4  ;;  %v1512_v47 = vpop.f32.mrb[33].mxu0 }
 0x482   : > { %v4001_v15 = vadd.f32 %v1511_v6, %v3658_v22 }
 0x483   : > { %v1515_v63 = vpop.f32.mrb[34].mxu0 }
 0x484   : > { %v1516_v28 = vadd.f32 %v1515_v63, %v3997_v4  ;;  %v1517_v40 = vpop.f32.mrb[35].mxu0  ;;  %1701 = vadd.xlane.f32.xlu0 %v4001_v15 }
 0x486   : > { %v4006_v62 = vadd.f32 %v1516_v28, %v3661_v43 }
 0x487   : > { %v1520_v3 = vpop.f32.mrb[36].mxu0 }
 0x488   : > { %v1521_v36 = vadd.f32 %v1520_v3, %v3997_v4  ;;  %1703 = vadd.xlane.f32.xlu1 %v4006_v62  ;;  %v1522_v25 = vpop.f32.mrb[37].mxu0 }
 0x48a   : > { %v4011_v23 = vadd.f32 %v1521_v36, %v3681_v10 }
 0x48b   : > { %v1525_v22 = vpop.f32.mrb[38].mxu0 }
 0x48c   : > { %v1526_v7 = vadd.f32 %v1525_v22, %v3997_v4  ;;  %v1527_v45 = vpop.f32.mrb[39].mxu0  ;;  %1705 = vadd.xlane.f32.xlu0 %v4011_v23 }
 0x48e   : > { %v4016_v57 = vadd.f32 %v1526_v7, %v3684_v48 }
 0x48f   : > { %v1530_v43 = vpop.f32.mrb[40].mxu0 }
 0x490   : > { %v1531_v44 = vadd.f32 %v1530_v43, %v3997_v4  ;;  %1707 = vadd.xlane.f32.xlu1 %v4016_v57  ;;  %v1532_v5 = vpop.f32.mrb[41].mxu0 }
 0x492   : > { %v4021_v16 = vadd.f32 %v1531_v44, %v3704_v54 }
 0x493   : > { %v1535_v10 = vpop.f32.mrb[42].mxu0 }
 0x494   : > { %v1536_v33 = vadd.f32 %v1535_v10, %v3997_v4  ;;  %v1537_v9 = vpop.f32.mrb[43].mxu0  ;;  %1709 = vadd.xlane.f32.xlu0 %v4021_v16 }
 0x496   : > { %v4026_v50 = vadd.f32 %v1536_v33, %v3707_v2 }
 0x497   : > { %v1540_v48 = vpop.f32.mrb[44].mxu0 }
 0x498   : > { %v1541_v20 = vadd.f32 %v1540_v48, %v3997_v4  ;;  %1711 = vadd.xlane.f32.xlu1 %v4026_v50  ;;  %v1542_v11 = vpop.f32.mrb[45].mxu0 }
 0x49a   : > { %v4031_v56 = vadd.f32 %v1541_v20, %v3727_v13 }
 0x49b   : > { %v1545_v54 = vpop.f32.mrb[46].mxu0 }
 0x49c   : > { %v1546_v21 = vadd.f32 %v1545_v54, %v3997_v4  ;;  %v1547_v52 = vpop.f32.mrb[47].mxu0  ;;  %1713 = vadd.xlane.f32.xlu0 %v4031_v56 }
 0x49e   : > { %v4036_v8 = vadd.f32 %v1546_v21, %v3730_v1 }
 0x49f   : > { %v1550_v2 = vpop.f32.mrb[48].mxu0 }
 0x4a0   : > { %v1551_v61 = vadd.f32 %v1550_v2, %v3997_v4  ;;  %1715 = vadd.xlane.f32.xlu1 %v4036_v8  ;;  %v1552_v30 = vpop.f32.mrb[49].mxu0 }
 0x4a2   : > { %v4041_v27 = vadd.f32 %v1551_v61, %v3748_v18 }
 0x4a3   : > { %v1555_v13 = vpop.f32.mrb[50].mxu0 }
 0x4a4   : > { %v1556_v31 = vadd.f32 %v1555_v13, %v3997_v4  ;;  %v1557_v60 = vpop.f32.mrb[51].mxu0  ;;  %1717 = vadd.xlane.f32.xlu0 %v4041_v27 }
 0x4a6   : > { %v4046_v6 = vadd.f32 %v1556_v31, %v3751_v26 }
 0x4a7   : > { %v1560_v1 = vpop.f32.mrb[52].mxu0 }
 0x4a8   : > { %v1561_v47 = vadd.f32 %v1560_v1, %v3997_v4  ;;  %1719 = vadd.xlane.f32.xlu1 %v4046_v6  ;;  %v1562_v63 = vpop.f32.mrb[53].mxu0 }
 0x4aa   : > { %v4051_v28 = vadd.f32 %v1561_v47, %v3766_v19 }
 0x4ab   : > { %v1565_v18 = vpop.f32.mrb[54].mxu0 }
 0x4ac   : > { %v1566_v40 = vadd.f32 %v1565_v18, %v3997_v4  ;;  %v1567_v3 = vpop.f32.mrb[55].mxu0  ;;  %1721 = vadd.xlane.f32.xlu0 %v4051_v28 }
 0x4ae   : > { %v4056_v36 = vadd.f32 %v1566_v40, %v3769_v34 }
 0x4af   : > { %v1570_v26 = vpop.f32.mrb[56].mxu0 }
 0x4b0   : > { %v1571_v25 = vadd.f32 %v1570_v26, %v3997_v4  ;;  %1723 = vadd.xlane.f32.xlu1 %v4056_v36  ;;  %v1572_v22 = vpop.f32.mrb[57].mxu0 }
 0x4b2   : > { %v4061_v7 = vadd.f32 %v1571_v25, %v3783_v17 }
 0x4b3   : > { %v1575_v19 = vpop.f32.mrb[58].mxu0 }
 0x4b4   : > { %v1576_v45 = vadd.f32 %v1575_v19, %v3997_v4  ;;  %v1577_v43 = vpop.f32.mrb[59].mxu0  ;;  %1725 = vadd.xlane.f32.xlu0 %v4061_v7 }
 0x4b6   : > { %v4066_v44 = vadd.f32 %v1576_v45, %v3786_v38 }
 0x4b7   : > { %v1580_v34 = vpop.f32.mrb[60].mxu0 }
 0x4b8   : > { %v1581_v5 = vadd.f32 %v1580_v34, %v3997_v4  ;;  %1727 = vadd.xlane.f32.xlu1 %v4066_v44  ;;  %v1582_v10 = vpop.f32.mrb[61].mxu0 }
 0x4ba   : > { %v4071_v33 = vadd.f32 %v1581_v5, %v3804_v14 }
 0x4bb   : > { %v1585_v17 = vpop.f32.mrb[62].mxu0 }
 0x4bc   : > { %v1586_v9 = vadd.f32 %v1585_v17, %v3997_v4  ;;  %v1587_v48 = vpop.f32.mrb[63].mxu0  ;;  %1729 = vadd.xlane.f32.xlu0 %v4071_v33 }
 0x4be   : > { %v4076_v20 = vadd.f32 %v1586_v9, %v3799_v12 }
 0x4bf   : > { %v1590_v38 = vpop.f32.mrb[64].mxu0 }
 0x4c0   : > { %v1591_v11 = vadd.f32 %v1590_v38, %v3997_v4  ;;  %1731 = vadd.xlane.f32.xlu1 %v4076_v20  ;;  %v1592_v54 = vpop.f32.mrb[65].mxu0 }
 0x4c2   : > { %v4081_v21 = vadd.f32 %v1591_v11, %v3821_v59 }
 0x4c3   : > { %v1595_v14 = vpop.f32.mrb[66].mxu0 }
 0x4c4   : > { %v1596_v52 = vadd.f32 %v1595_v14, %v3997_v4  ;;  %v1597_v2 = vpop.f32.mrb[67].mxu0  ;;  %1733 = vadd.xlane.f32.xlu0 %v4081_v21 }
 0x4c6   : > { %v4086_v61 = vadd.f32 %v1596_v52, %v3816_v53 }
 0x4c7   : > { %v1600_v12 = vpop.f32.mrb[68].mxu0 }
 0x4c8   : > { %v1601_v30 = vadd.f32 %v1600_v12, %v3997_v4  ;;  %1735 = vadd.xlane.f32.xlu1 %v4086_v61  ;;  %v1602_v13 = vpop.f32.mrb[69].mxu0 }
 0x4ca   : > { %v4091_v31 = vadd.f32 %v1601_v30, %v3837_v32 }
 0x4cb   : > { %v1605_v59 = vpop.f32.mrb[70].mxu0 }
 0x4cc   : > { %v1606_v60 = vadd.f32 %v1605_v59, %v3997_v4  ;;  %v1607_v1 = vpop.f32.mrb[71].mxu0  ;;  %1737 = vadd.xlane.f32.xlu0 %v4091_v31 }
 0x4ce   : > { %v4096_v47 = vadd.f32 %v1606_v60, %v3833_v24 }
 0x4d0   : > { %1739 = vadd.xlane.f32.xlu1 %v4096_v47 }
 0x517   : > { %v1610_v53 = vpop.f32.mrb[72].mxu0 }
 0x518   : > { %v1611_v63 = vadd.f32 %v1610_v53, %v3997_v4  ;;  %v1612_v18 = vpop.f32.mrb[73].mxu0 }
 0x51a   : > { %v4101_v40 = vadd.f32 %v1611_v63, %v3857_v39 }
 0x51b   : > { %v1615_v32 = vpop.f32.mrb[74].mxu0 }
 0x51c   : > { %v1616_v3 = vadd.f32 %v1615_v32, %v3997_v4  ;;  %v1617_v26 = vpop.f32.mrb[75].mxu0  ;;  %1741 = vadd.xlane.f32.xlu0 %v4101_v40  ;;  %v1704_v32 = vpop.xlane.xlu1 %1703 }
 0x51e   : > { %v4106_v25 = vadd.f32 %v1616_v3, %v3860_v42 }
 0x51f   : > { %v1620_v24 = vpop.f32.mrb[76].mxu0 }
 0x520   : > { %v1621_v22 = vadd.f32 %v1620_v24, %v3997_v4  ;;  %1743 = vadd.xlane.f32.xlu1 %v4106_v25  ;;  %v1622_v19 = vpop.f32.mrb[77].mxu0 }
 0x522   : > { %v4111_v45 = vadd.f32 %v1621_v22, %v3870_v0  ;;  %v1766_v22 = vmul.f32 0.0078125, %v1704_v32 }
 0x523   : > { %v1625_v39 = vpop.f32.mrb[78].mxu0 }
 0x524   : > { %v1626_v43 = vadd.f32 %v1625_v39, %v3997_v4  ;;  %v1627_v34 = vpop.f32.mrb[79].mxu0  ;;  %1745 = vadd.xlane.f32.xlu0 %v4111_v45 }
 0x526   : > { %v4116_v5 = vadd.f32 %v1626_v43, %v3873_v37  ;;  %v1708_v43 = vpop.xlane.xlu1 %1707 }
 0x527   : > { %v1630_v42 = vpop.f32.mrb[64].mxu1 }
 0x528   : > { %v1631_v10 = vadd.f32 %v1630_v42, %v3997_v4  ;;  %1747 = vadd.xlane.f32.xlu1 %v4116_v5  ;;  %v1632_v17 = vpop.f32.mrb[65].mxu1 }
 0x52a   : > { %v4121_v9 = vadd.f32 %v1631_v10, %v3883_v51 }
 0x52b   : > { %v1635_v0 = vpop.f32.mrb[66].mxu1 }
 0x52c   : > { %v1636_v48 = vadd.f32 %v1635_v0, %v3997_v4  ;;  %v1637_v38 = vpop.f32.mrb[67].mxu1  ;;  %1749 = vadd.xlane.f32.xlu0 %v4121_v9  ;;  %v4159_v0 = vsub.f32 %v4006_v62, %v1766_v22 }
 0x52e   : > { %v4126_v11 = vadd.f32 %v1636_v48, %v3886_v49  ;;  %v1768_v48 = vmul.f32 0.0078125, %v1708_v43  ;;  %v1830_v62 = vmul.f32 %v4159_v0, %v4159_v0 }
 0x52f   : > { %v1640_v37 = vpop.f32.mrb[68].mxu1 }
 0x530   : > { %v1641_v54 = vadd.f32 %v1640_v37, %v3997_v4  ;;  %v1642_v14 = vpop.f32.mrb[69].mxu1  ;;  %1751 = vadd.xlane.f32.xlu1 %v4126_v11  ;;  %v1712_v37 = vpop.xlane.xlu1 %1711 }
 0x532   : > { %v4131_v52 = vadd.f32 %v1641_v54, %v3896_v41  ;;  %v1702_v41 = vpop.xlane.xlu0 %1701 }
 0x533   : > { %v1645_v51 = vpop.f32.mrb[70].mxu1  ;;  %v1765_v18 = vmul.f32 0.0078125, %v1702_v41 }
 0x534   : > { %v1646_v2 = vadd.f32 %v1645_v51, %v3997_v4  ;;  %v1647_v12 = vpop.f32.mrb[71].mxu1  ;;  %1753 = vadd.xlane.f32.xlu0 %v4131_v52  ;;  %v1770_v51 = vmul.f32 0.0078125, %v1712_v37 }
 0x535   : > { %v4151_v19 = vsub.f32 %v4001_v15, %v1765_v18 }
 0x536   : > { %v4136_v30 = vadd.f32 %v1646_v2, %v3899_v46  ;;  %v1706_v3 = vpop.xlane.xlu0 %1705 }
 0x537   : > { %v1650_v49 = vpop.f32.mrb[72].mxu1  ;;  %v1767_v39 = vmul.f32 0.0078125, %v1706_v3 }
 0x538   : > { %v1651_v13 = vadd.f32 %v1650_v49, %v3997_v4  ;;  %v1652_v59 = vpop.f32.mrb[73].mxu1  ;;  %1755 = vadd.xlane.f32.xlu1 %v4136_v30 }
 0x539   : > { %v4162_v38 = vsub.f32 %v4011_v23, %v1767_v39  ;;  %v4183_v59 = vsub.f32 %v4026_v50, %v1770_v51 }
 0x53a   : > { %v4141_v60 = vadd.f32 %v1651_v13, %v3909_v55  ;;  %v1710_v42 = vpop.xlane.xlu0 %1709 }
 0x53b   : > { %v1655_v1 = vpop.f32.mrb[74].mxu1  ;;  %v1769_v15 = vmul.f32 0.0078125, %v1710_v42  ;;  %v1831_v12 = vmul.f32 %v4162_v38, %v4162_v38 }
 0x53c   : > { %v1656_v53 = vadd.f32 %v1655_v1, %v3997_v4  ;;  %v1657_v63 = vpop.f32.mrb[75].mxu1  ;;  %1757 = vadd.xlane.f32.xlu0 %v4141_v60 }
 0x53d   : > { %v4176_v23 = vsub.f32 %v4021_v16, %v1769_v15 }
 0x53e   : > { %v4146_v46 = vadd.f32 %v1656_v53, %v3912_v58  ;;  %v1714_v14 = vpop.xlane.xlu0 %1713 }
 0x53f   : > { %v1660_v26 = vpop.f32.mrb[76].mxu1  ;;  %v1771_v2 = vmul.f32 0.0078125, %v1714_v14  ;;  %v1833_v53 = vmul.f32 %v4176_v23, %v4176_v23 }
 0x540   : > { %v1661_v24 = vadd.f32 %v1660_v26, %v3997_v4  ;;  %1759 = vadd.xlane.f32.xlu1 %v4146_v46  ;;  %v1662_v55 = vpop.f32.mrb[77].mxu1 }
 0x541   : > { %v4186_v41 = vsub.f32 %v4031_v56, %v1771_v2  ;;  %v1834_v56 = vmul.f32 %v4183_v59, %v4183_v59 }
 0x542   : > { %v4154_v34 = vadd.f32 %v1661_v24, %v3922_v29  ;;  %v1829_v29 = vmul.f32 %v4151_v19, %v4151_v19  ;;  %v1718_v49 = vpop.xlane.xlu0 %1717 }
 0x543   : > { %v1665_v10 = vpop.f32.mrb[78].mxu1  ;;  %v1773_v16 = vmul.f32 0.0078125, %v1718_v49  ;;  %v1835_v24 = vmul.f32 %v4186_v41, %v4186_v41 }
 0x544   : > { %v1666_v58 = vadd.f32 %v1665_v10, %v3997_v4  ;;  %v1667_v17 = vpop.f32.mrb[79].mxu1  ;;  %1761 = vadd.xlane.f32.xlu0 %v4154_v34  ;;  %v4171_v4 = vsub.f32 %v4016_v57, %v1768_v48 }
 0x545   : > { %v4194_v3 = vsub.f32 %v4041_v27, %v1773_v16 }
 0x546   : > { %v4165_v54 = vadd.f32 %v1666_v58, %v3925_v35  ;;  %v1716_v35 = vpop.xlane.xlu1 %1715  ;;  %v1832_v57 = vmul.f32 %v4171_v4, %v4171_v4  ;;  %v1722_v63 = vpop.xlane.xlu0 %1721 }
 0x547   : > { %v1772_v13 = vmul.f32 0.0078125, %v1716_v35  ;;  %v1775_v50 = vmul.f32 0.0078125, %v1722_v63  ;;  %v1837_v10 = vmul.f32 %v4194_v3, %v4194_v3 }
 0x548   : > { %1763 = vadd.xlane.f32.xlu1 %v4165_v54  ;;  %1861 = vadd.xlane.f32.xlu0 %v1829_v29 }
 0x549   : > { %v4191_v18 = vsub.f32 %v4036_v8, %v1772_v13  ;;  %v4206_v27 = vsub.f32 %v4051_v28, %v1775_v50 }
 0x54a   : > { %v1720_v1 = vpop.xlane.xlu1 %1719  ;;  %v1726_v55 = vpop.xlane.xlu0 %1725 }
 0x54b   : > { %v1774_v32 = vmul.f32 0.0078125, %v1720_v1  ;;  %v1836_v8 = vmul.f32 %v4191_v18, %v4191_v18  ;;  %v1777_v43 = vmul.f32 0.0078125, %v1726_v55  ;;  %v1839_v29 = vmul.f32 %v4206_v27, %v4206_v27 }
 0x54c   : > { %1863 = vadd.xlane.f32.xlu1 %v1830_v62  ;;  %1865 = vadd.xlane.f32.xlu0 %v1831_v12 }
 0x54d   : > { %v4201_v22 = vsub.f32 %v4046_v6, %v1774_v32  ;;  %v4216_v15 = vsub.f32 %v4061_v7, %v1777_v43 }
 0x54e   : > { %v1724_v26 = vpop.xlane.xlu1 %1723  ;;  %v1730_v58 = vpop.xlane.xlu0 %1729 }
 0x54f   : > { %v1776_v39 = vmul.f32 0.0078125, %v1724_v26  ;;  %v1838_v6 = vmul.f32 %v4201_v22, %v4201_v22  ;;  %v1779_v28 = vmul.f32 0.0078125, %v1730_v58  ;;  %v1841_v35 = vmul.f32 %v4216_v15, %v4216_v15 }
 0x550   : > { %1867 = vadd.xlane.f32.xlu1 %v1832_v57  ;;  %1869 = vadd.xlane.f32.xlu0 %v1833_v53 }
 0x551   : > { %v4213_v48 = vsub.f32 %v4056_v36, %v1776_v39  ;;  %v4224_v2 = vsub.f32 %v4071_v33, %v1779_v28 }
 0x552   : > { %v1728_v42 = vpop.xlane.xlu1 %1727  ;;  %v1734_v14 = vpop.xlane.xlu0 %1733 }
 0x553   : > { %v1778_v17 = vmul.f32 0.0078125, %v1728_v42  ;;  %v1781_v36 = vmul.f32 0.0078125, %v1734_v14  ;;  %v1840_v7 = vmul.f32 %v4213_v48, %v4213_v48  ;;  %v1843_v1 = vmul.f32 %v4224_v2, %v4224_v2 }
 0x554   : > { %1871 = vadd.xlane.f32.xlu1 %v1834_v56  ;;  %1873 = vadd.xlane.f32.xlu0 %v1835_v24 }
 0x555   : > { %v4221_v62 = vsub.f32 %v4066_v44, %v1778_v17  ;;  %v4236_v33 = vsub.f32 %v4081_v21, %v1781_v36 }
 0x556   : > { %v1732_v37 = vpop.xlane.xlu1 %1731 }
 0x557   : > { %v1780_v51 = vmul.f32 0.0078125, %v1732_v37  ;;  %v1842_v44 = vmul.f32 %v4221_v62, %v4221_v62  ;;  %v1845_v21 = vmul.f32 %v4236_v33, %v4236_v33 }
 0x558   : > { %1875 = vadd.xlane.f32.xlu1 %v1836_v8  ;;  %1877 = vadd.xlane.f32.xlu0 %v1837_v10 }
 0x559   : > { %v1738_v49 = vpop.xlane.xlu0 %1737  ;;  %v4231_v13 = vsub.f32 %v4076_v20, %v1780_v51 }
 0x55a   : > { %v1736_v12 = vpop.xlane.xlu1 %1735  ;;  %v1783_v16 = vmul.f32 0.0078125, %v1738_v49 }
 0x55b   : > { %v1782_v57 = vmul.f32 0.0078125, %v1736_v12  ;;  %v1844_v63 = vmul.f32 %v4231_v13, %v4231_v13 }
 0x55c   : > { %1879 = vadd.xlane.f32.xlu1 %v1838_v6  ;;  %1881 = vadd.xlane.f32.xlu0 %v1839_v29  ;;  %v4246_v32 = vsub.f32 %v4091_v31, %v1783_v16 }
 0x55d   : > { %v4243_v20 = vsub.f32 %v4086_v61, %v1782_v57 }
 0x55e   : > { %v1740_v53 = vpop.xlane.xlu1 %1739  ;;  %v1847_v24 = vmul.f32 %v4246_v32, %v4246_v32 }
 0x55f   : > { %v1784_v50 = vmul.f32 0.0078125, %v1740_v53  ;;  %v1846_v56 = vmul.f32 %v4243_v20, %v4243_v20 }
 0x560   : > { %1883 = vadd.xlane.f32.xlu1 %v1840_v7  ;;  %1885 = vadd.xlane.f32.xlu0 %v1841_v35 }
 0x561   : > { %v4251_v26 = vsub.f32 %v4096_v47, %v1784_v50 }
 0x563   : > { %v1848_v61 = vmul.f32 %v4251_v26, %v4251_v26 }
 0x564   : > { %1887 = vadd.xlane.f32.xlu1 %v1842_v44  ;;  %1889 = vadd.xlane.f32.xlu0 %v1843_v1 }
 0x568   : > { %1891 = vadd.xlane.f32.xlu1 %v1844_v63  ;;  %1893 = vadd.xlane.f32.xlu0 %v1845_v21 }
 0x56c   : > { %1895 = vadd.xlane.f32.xlu1 %v1846_v56  ;;  %1897 = vadd.xlane.f32.xlu0 %v1847_v24 }
 0x570   : > { %1899 = vadd.xlane.f32.xlu1 %v1848_v61 }
 0x5a9   : > { %v1742_v31 = vpop.xlane.xlu0 %1741 }
 0x5aa   : > { %v1785_v55 = vmul.f32 0.0078125, %v1742_v31 }
 0x5ac   : > { %v4260_v8 = vsub.f32 %v4101_v40, %v1785_v55 }
 0x5ad   : > { %v1744_v39 = vpop.xlane.xlu1 %1743 }
 0x5ae   : > { %v1786_v47 = vmul.f32 0.0078125, %v1744_v39  ;;  %v1849_v43 = vmul.f32 %v4260_v8, %v4260_v8 }
 0x5b0   : > { %v4265_v42 = vsub.f32 %v4106_v25, %v1786_v47  ;;  %1901 = vadd.xlane.f32.xlu0 %v1849_v43 }
 0x5b1   : > { %v1746_v10 = vpop.xlane.xlu0 %1745 }
 0x5b2   : > { %v1787_v58 = vmul.f32 0.0078125, %v1746_v10  ;;  %v1850_v17 = vmul.f32 %v4265_v42, %v4265_v42 }
 0x5b4   : > { %v4270_v6 = vsub.f32 %v4111_v45, %v1787_v58  ;;  %1903 = vadd.xlane.f32.xlu1 %v1850_v17 }
 0x5b5   : > { %v1748_v40 = vpop.xlane.xlu1 %1747 }
 0x5b6   : > { %v1788_v28 = vmul.f32 0.0078125, %v1748_v40  ;;  %v1851_v37 = vmul.f32 %v4270_v6, %v4270_v6 }
 0x5b8   : > { %v4275_v29 = vsub.f32 %v4116_v5, %v1788_v28  ;;  %1905 = vadd.xlane.f32.xlu0 %v1851_v37 }
 0x5b9   : > { %v1750_v25 = vpop.xlane.xlu0 %1749 }
 0x5ba   : > { %v1789_v14 = vmul.f32 0.0078125, %v1750_v25  ;;  %v1852_v51 = vmul.f32 %v4275_v29, %v4275_v29 }
 0x5bc   : > { %v4280_v36 = vsub.f32 %v4121_v9, %v1789_v14  ;;  %1907 = vadd.xlane.f32.xlu1 %v1852_v51 }
 0x5bd   : > { %v1752_v45 = vpop.xlane.xlu1 %1751 }
 0x5be   : > { %v1790_v7 = vmul.f32 0.0078125, %v1752_v45  ;;  %v1853_v35 = vmul.f32 %v4280_v36, %v4280_v36 }
 0x5c0   : > { %v4285_v12 = vsub.f32 %v4126_v11, %v1790_v7  ;;  %1909 = vadd.xlane.f32.xlu0 %v1853_v35 }
 0x5c1   : > { %v1754_v5 = vpop.xlane.xlu0 %1753 }
 0x5c2   : > { %v1791_v49 = vmul.f32 0.0078125, %v1754_v5  ;;  %v1854_v44 = vmul.f32 %v4285_v12, %v4285_v12 }
 0x5c4   : > { %v4290_v57 = vsub.f32 %v4131_v52, %v1791_v49  ;;  %1911 = vadd.xlane.f32.xlu1 %v1854_v44 }
 0x5c5   : > { %v1756_v9 = vpop.xlane.xlu1 %1755 }
 0x5c6   : > { %v1792_v16 = vmul.f32 0.0078125, %v1756_v9  ;;  %v1855_v1 = vmul.f32 %v4290_v57, %v4290_v57 }
 0x5c8   : > { %v4295_v53 = vsub.f32 %v4136_v30, %v1792_v16  ;;  %1913 = vadd.xlane.f32.xlu0 %v1855_v1 }
 0x5c9   : > { %v1758_v11 = vpop.xlane.xlu0 %1757 }
 0x5ca   : > { %v1793_v63 = vmul.f32 0.0078125, %v1758_v11  ;;  %v1856_v50 = vmul.f32 %v4295_v53, %v4295_v53 }
 0x5cc   : > { %v4300_v21 = vsub.f32 %v4141_v60, %v1793_v63  ;;  %1915 = vadd.xlane.f32.xlu1 %v1856_v50  ;;  %v4319_v63 = vld [vmem:[#allocation10 + $0x5] ss:$0 sm:$0xff] }
 0x5cd   : > { %v1760_v52 = vpop.xlane.xlu1 %1759 }
 0x5ce   : > { %v1794_v56 = vmul.f32 0.0078125, %v1760_v52  ;;  %v1857_v24 = vmul.f32 %v4300_v21, %v4300_v21 }
 0x5d0   : > { %v4305_v61 = vsub.f32 %v4146_v46, %v1794_v56  ;;  %1917 = vadd.xlane.f32.xlu0 %v1857_v24 }
 0x5d1   : > { %v1762_v30 = vpop.xlane.xlu0 %1761 }
 0x5d2   : > { %v1795_v31 = vmul.f32 0.0078125, %v1762_v30  ;;  %v1858_v55 = vmul.f32 %v4305_v61, %v4305_v61 }
 0x5d4   : > { %v4310_v39 = vsub.f32 %v4154_v34, %v1795_v31  ;;  %1919 = vadd.xlane.f32.xlu1 %v1858_v55  ;;  %v4322_v31 = vld [vmem:[#allocation10 + $0x6] ss:$0 sm:$0xff] }
 0x5d5   : > { %v1764_v60 = vpop.xlane.xlu1 %1763  ;;  %v1862_v47 = vpop.xlane.xlu0 %1861 }
 0x5d6   : > { %v1796_v43 = vmul.f32 0.0078125, %v1764_v60  ;;  %v1925_v10 = vmul.f32 0.0078125, %v1862_v47  ;;  %v1859_v58 = vmul.f32 %v4310_v39, %v4310_v39 }
 0x5d8   : > { %v4315_v46 = vsub.f32 %v4165_v54, %v1796_v43  ;;  %v1957_v17 = vadd.f32 1e-05, %v1925_v10  ;;  %1921 = vadd.xlane.f32.xlu0 %v1859_v58 }
 0x5d9   : > { %v1864_v40 = vpop.xlane.xlu1 %1863  ;;  %v1866_v28 = vpop.xlane.xlu0 %1865 }
 0x5da   : > { %2665 = vrsqrt.f32 %v1957_v17  ;;  %v1926_v37 = vmul.f32 0.0078125, %v1864_v40  ;;  %v1927_v25 = vmul.f32 0.0078125, %v1866_v28  ;;  %v1860_v34 = vmul.f32 %v4315_v46, %v4315_v46 }
 0x5dc   : > { %v1958_v14 = vadd.f32 1e-05, %v1926_v37  ;;  %v1959_v51 = vadd.f32 1e-05, %v1927_v25  ;;  %1923 = vadd.xlane.f32.xlu1 %v1860_v34 }
 0x5dd   : > { %v1868_v45 = vpop.xlane.xlu1 %1867  ;;  %v1870_v7 = vpop.xlane.xlu0 %1869 }
 0x5de   : > { %2667 = vrsqrt.f32 %v1958_v14  ;;  %v1928_v35 = vmul.f32 0.0078125, %v1868_v45  ;;  %v1929_v5 = vmul.f32 0.0078125, %v1870_v7 }
 0x5df   : > { %2669 = vrsqrt.f32 %v1959_v51 }
 0x5e0   : > { %v1960_v54 = vadd.f32 1e-05, %v1928_v35  ;;  %v1961_v49 = vadd.f32 1e-05, %v1929_v5 }
 0x5e1   : > { %v1872_v44 = vpop.xlane.xlu1 %1871  ;;  %v1874_v9 = vpop.xlane.xlu0 %1873 }
 0x5e2   : > { %2671 = vrsqrt.f32 %v1960_v54  ;;  %v1930_v16 = vmul.f32 0.0078125, %v1872_v44  ;;  %v1931_v1 = vmul.f32 0.0078125, %v1874_v9 }
 0x5e3   : > { %2673 = vrsqrt.f32 %v1961_v49 }
 0x5e4   : > { %v2666_v11 = vpop.eup %2665  ;;  %v1962_v50 = vadd.f32 1e-05, %v1930_v16  ;;  %v1963_v52 = vadd.f32 1e-05, %v1931_v1 }
 0x5e5   : > { %v2021_v56 = vmul.f32 %v2666_v11, %v4151_v19  ;;  %v1876_v24 = vpop.xlane.xlu1 %1875  ;;  %v1878_v30 = vpop.xlane.xlu0 %1877 }
 0x5e6   : > { %2675 = vrsqrt.f32 %v1962_v50  ;;  %v1932_v55 = vmul.f32 0.0078125, %v1876_v24  ;;  %v1933_v60 = vmul.f32 0.0078125, %v1878_v30 }
 0x5e7   : > { %v2053_v47 = vmul.f32 %v2021_v56, %v4319_v63  ;;  %2677 = vrsqrt.f32 %v1963_v52 }
 0x5e8   : > { %v2668_v43 = vpop.eup %2667  ;;  %v1964_v10 = vadd.f32 1e-05, %v1932_v55  ;;  %v1965_v58 = vadd.f32 1e-05, %v1933_v60 }
 0x5e9   : > { %v2670_v17 = vpop.eup %2669  ;;  %v2085_v40 = vadd.f32 %v2053_v47, %v4322_v31  ;;  %v2022_v28 = vmul.f32 %v2668_v43, %v4159_v0  ;;  %v1880_v19 = vpop.xlane.xlu1 %1879 }
 0x5ea   : > { %v1882_v37 = vpop.xlane.xlu0 %1881  ;;  %v2023_v25 = vmul.f32 %v2670_v17, %v4162_v38  ;;  %2679 = vrsqrt.f32 %v1964_v10  ;;  %v1934_v34 = vmul.f32 0.0078125, %v1880_v19 }
 0x5eb   : > { %v1935_v14 = vmul.f32 0.0078125, %v1882_v37  ;;  %2117 = vst [vmem:[%s4330_s24] sm:$0xff] %v2085_v40  ;;  %v2054_v51 = vmul.f32 %v2022_v28, %v4319_v63  ;;  %2681 = vrsqrt.f32 %v1965_v58 }
 0x5ec   : > { %v2672_v45 = vpop.eup %2671  ;;  %v2055_v7 = vmul.f32 %v2023_v25, %v4319_v63  ;;  %v1966_v0 = vadd.f32 1e-05, %v1934_v34 }
 0x5ed   : > { %v1967_v35 = vadd.f32 1e-05, %v1935_v14  ;;  %v2674_v5 = vpop.eup %2673  ;;  %v2086_v38 = vadd.f32 %v2054_v51, %v4322_v31  ;;  %v2024_v54 = vmul.f32 %v2672_v45, %v4171_v4  ;;  %v1884_v49 = vpop.xlane.xlu1 %1883 }
 0x5ee   : > { %v1886_v44 = vpop.xlane.xlu0 %1885  ;;  %v2087_v9 = vadd.f32 %v2055_v7, %v4322_v31  ;;  %v2025_v16 = vmul.f32 %v2674_v5, %v4176_v23  ;;  %2683 = vrsqrt.f32 %v1966_v0  ;;  %v1936_v1 = vmul.f32 0.0078125, %v1884_v49 }
 0x5ef   : > { %2118 = vst [vmem:[%s4330_s24 + $0x8] sm:$0xff] %v2086_v38  ;;  %v2056_v11 = vmul.f32 %v2024_v54, %v4319_v63  ;;  %2685 = vrsqrt.f32 %v1967_v35  ;;  %v1937_v50 = vmul.f32 0.0078125, %v1886_v44 }
 0x5f0   : > { %v2676_v52 = vpop.eup %2675  ;;  %2119 = vst [vmem:[%s4330_s24 + $0x10] sm:$0xff] %v2087_v9  ;;  %v2057_v56 = vmul.f32 %v2025_v16, %v4319_v63  ;;  %v1968_v24 = vadd.f32 1e-05, %v1936_v1 }
 0x5f1   : > { %v2678_v4 = vpop.eup %2677  ;;  %v2088_v30 = vadd.f32 %v2056_v11, %v4322_v31  ;;  %v2026_v55 = vmul.f32 %v2676_v52, %v4183_v59  ;;  %v1969_v23 = vadd.f32 1e-05, %v1937_v50  ;;  %v1888_v60 = vpop.xlane.xlu1 %1887 }
 0x5f2   : > { %v1890_v47 = vpop.xlane.xlu0 %1889  ;;  %v2089_v43 = vadd.f32 %v2057_v56, %v4322_v31  ;;  %v2027_v10 = vmul.f32 %v2678_v4, %v4186_v41  ;;  %2687 = vrsqrt.f32 %v1968_v24  ;;  %v1938_v58 = vmul.f32 0.0078125, %v1888_v60 }
 0x5f3   : > { %2120 = vst [vmem:[%s4330_s24 + $0x18] sm:$0xff] %v2088_v30  ;;  %v2058_v17 = vmul.f32 %v2026_v55, %v4319_v63  ;;  %2689 = vrsqrt.f32 %v1969_v23  ;;  %v1939_v40 = vmul.f32 0.0078125, %v1890_v47 }
 0x5f4   : > { %v2680_v28 = vpop.eup %2679  ;;  %2121 = vst [vmem:[%s4330_s24 + $0x20] sm:$0xff] %v2089_v43  ;;  %v2059_v19 = vmul.f32 %v2027_v10, %v4319_v63  ;;  %v1970_v59 = vadd.f32 1e-05, %v1938_v58 }
 0x5f5   : > { %v2682_v37 = vpop.eup %2681  ;;  %v2090_v25 = vadd.f32 %v2058_v17, %v4322_v31  ;;  %v2028_v34 = vmul.f32 %v2680_v28, %v4191_v18  ;;  %v1971_v41 = vadd.f32 1e-05, %v1939_v40  ;;  %v1892_v14 = vpop.xlane.xlu1 %1891 }
 0x5f6   : > { %v1894_v51 = vpop.xlane.xlu0 %1893  ;;  %v2091_v45 = vadd.f32 %v2059_v19, %v4322_v31  ;;  %v2029_v7 = vmul.f32 %v2682_v37, %v4194_v3  ;;  %2691 = vrsqrt.f32 %v1970_v59  ;;  %v1940_v0 = vmul.f32 0.0078125, %v1892_v14 }
 0x5f7   : > { %2122 = vst [vmem:[%s4330_s24 + $0x28] sm:$0xff] %v2090_v25  ;;  %v2060_v35 = vmul.f32 %v2028_v34, %v4319_v63  ;;  %2693 = vrsqrt.f32 %v1971_v41  ;;  %v1941_v5 = vmul.f32 0.0078125, %v1894_v51 }
 0x5f8   : > { %v2684_v38 = vpop.eup %2683  ;;  %2123 = vst [vmem:[%s4330_s24 + $0x30] sm:$0xff] %v2091_v45  ;;  %v2061_v54 = vmul.f32 %v2029_v7, %v4319_v63  ;;  %v1972_v18 = vadd.f32 1e-05, %v1940_v0 }
 0x5f9   : > { %v2686_v49 = vpop.eup %2685  ;;  %v2092_v44 = vadd.f32 %v2060_v35, %v4322_v31  ;;  %v2030_v9 = vmul.f32 %v2684_v38, %v4201_v22  ;;  %v1973_v3 = vadd.f32 1e-05, %v1941_v5  ;;  %v1896_v16 = vpop.xlane.xlu1 %1895 }
 0x5fa   : > { %v1898_v1 = vpop.xlane.xlu0 %1897  ;;  %v2093_v11 = vadd.f32 %v2061_v54, %v4322_v31  ;;  %v2031_v50 = vmul.f32 %v2686_v49, %v4206_v27  ;;  %2695 = vrsqrt.f32 %v1972_v18  ;;  %v1942_v52 = vmul.f32 0.0078125, %v1896_v16 }
 0x5fb   : > { %2124 = vst [vmem:[%s4330_s24 + $0x38] sm:$0xff] %v2092_v44  ;;  %v2062_v56 = vmul.f32 %v2030_v9, %v4319_v63  ;;  %2697 = vrsqrt.f32 %v1973_v3  ;;  %v1943_v24 = vmul.f32 0.0078125, %v1898_v1 }
 0x5fc   : > { %v2688_v4 = vpop.eup %2687  ;;  %2125 = vst [vmem:[%s4330_s24 + $0x40] sm:$0xff] %v2093_v11  ;;  %v2063_v22 = vmul.f32 %v2031_v50, %v4319_v63  ;;  %v1974_v30 = vadd.f32 1e-05, %v1942_v52 }
 0x5fd   : > { %v2690_v55 = vpop.eup %2689  ;;  %v2094_v23 = vadd.f32 %v2062_v56, %v4322_v31  ;;  %v2032_v60 = vmul.f32 %v2688_v4, %v4213_v48  ;;  %v1975_v27 = vadd.f32 1e-05, %v1943_v24  ;;  %v1900_v47 = vpop.xlane.xlu1 %1899 }
 0x5fe   : > { %v2095_v43 = vadd.f32 %v2063_v22, %v4322_v31  ;;  %v2033_v10 = vmul.f32 %v2690_v55, %v4216_v15  ;;  %2699 = vrsqrt.f32 %v1974_v30  ;;  %v1944_v58 = vmul.f32 0.0078125, %v1900_v47 }
 0x5ff   : > { %2126 = vst [vmem:[%s4330_s24 + $0x48] sm:$0xff] %v2094_v23  ;;  %v2064_v17 = vmul.f32 %v2032_v60, %v4319_v63  ;;  %2701 = vrsqrt.f32 %v1975_v27 }
 0x600   : > { %v2692_v40 = vpop.eup %2691  ;;  %2127 = vst [vmem:[%s4330_s24 + $0x50] sm:$0xff] %v2095_v43  ;;  %v2065_v28 = vmul.f32 %v2033_v10, %v4319_v63  ;;  %v1976_v19 = vadd.f32 1e-05, %v1944_v58 }
 0x601   : > { %v2694_v48 = vpop.eup %2693  ;;  %v2096_v59 = vadd.f32 %v2064_v17, %v4322_v31  ;;  %v2034_v37 = vmul.f32 %v2692_v40, %v4221_v62 }
 0x602   : > { %v2097_v15 = vadd.f32 %v2065_v28, %v4322_v31  ;;  %v2035_v25 = vmul.f32 %v2694_v48, %v4224_v2  ;;  %2703 = vrsqrt.f32 %v1976_v19 }
 0x603   : > { %2128 = vst [vmem:[%s4330_s24 + $0x58] sm:$0xff] %v2096_v59  ;;  %v2066_v34 = vmul.f32 %v2034_v37, %v4319_v63 }
 0x604   : > { %v2696_v41 = vpop.eup %2695  ;;  %2129 = vst [vmem:[%s4330_s24 + $0x60] sm:$0xff] %v2097_v15  ;;  %v2067_v14 = vmul.f32 %v2035_v25, %v4319_v63 }
 0x605   : > { %v2698_v51 = vpop.eup %2697  ;;  %v2098_v45 = vadd.f32 %v2066_v34, %v4322_v31  ;;  %v2036_v7 = vmul.f32 %v2696_v41, %v4231_v13 }
 0x606   : > { %v2099_v62 = vadd.f32 %v2067_v14, %v4322_v31  ;;  %v2037_v0 = vmul.f32 %v2698_v51, %v4236_v33 }
 0x607   : > { %2130 = vst [vmem:[%s4330_s24 + $0x68] sm:$0xff] %v2098_v45  ;;  %v2068_v2 = vmul.f32 %v2036_v7, %v4319_v63 }
 0x608   : > { %v2700_v35 = vpop.eup %2699  ;;  %2131 = vst [vmem:[%s4330_s24 + $0x70] sm:$0xff] %v2099_v62  ;;  %v2069_v5 = vmul.f32 %v2037_v0, %v4319_v63 }
 0x609   : > { %v2702_v38 = vpop.eup %2701  ;;  %v2100_v54 = vadd.f32 %v2068_v2, %v4322_v31  ;;  %v2038_v13 = vmul.f32 %v2700_v35, %v4243_v20 }
 0x60a   : > { %v2101_v18 = vadd.f32 %v2069_v5, %v4322_v31  ;;  %v2039_v49 = vmul.f32 %v2702_v38, %v4246_v32 }
 0x60b   : > { %2132 = vst [vmem:[%s4330_s24 + $0x78] sm:$0xff] %v2100_v54  ;;  %v2070_v33 = vmul.f32 %v2038_v13, %v4319_v63 }
 0x60c   : > { %v2704_v44 = vpop.eup %2703  ;;  %2133 = vst [vmem:[%s4330_s24 + $0x80] sm:$0xff] %v2101_v18  ;;  %v2071_v9 = vmul.f32 %v2039_v49, %v4319_v63 }
 0x60d   : > { %v2102_v3 = vadd.f32 %v2070_v33, %v4322_v31  ;;  %v2040_v16 = vmul.f32 %v2704_v44, %v4251_v26 }
 0x60e   : > { %v2103_v1 = vadd.f32 %v2071_v9, %v4322_v31 }
 0x60f   : > { %2134 = vst [vmem:[%s4330_s24 + $0x88] sm:$0xff] %v2102_v3  ;;  %v2072_v20 = vmul.f32 %v2040_v16, %v4319_v63 }
 0x610   : > { %2135 = vst [vmem:[%s4330_s24 + $0x90] sm:$0xff] %v2103_v1 }
 0x611   : > { %v2104_v11 = vadd.f32 %v2072_v20, %v4322_v31 }
 0x613   : > { %2136 = vst [vmem:[%s4330_s24 + $0x98] sm:$0xff] %v2104_v11 }
 0x63d   : > { %v1902_v32 = vpop.xlane.xlu0 %1901 }
 0x63e   : > { %v1945_v50 = vmul.f32 0.0078125, %v1902_v32 }
 0x640   : > { %v1977_v52 = vadd.f32 1e-05, %v1945_v50 }
 0x641   : > { %v1904_v56 = vpop.xlane.xlu1 %1903 }
 0x642   : > { %2705 = vrsqrt.f32 %v1977_v52  ;;  %v1946_v24 = vmul.f32 0.0078125, %v1904_v56 }
 0x644   : > { %v1978_v4 = vadd.f32 1e-05, %v1946_v24 }
 0x645   : > { %v1906_v22 = vpop.xlane.xlu0 %1905 }
 0x646   : > { %2707 = vrsqrt.f32 %v1978_v4  ;;  %v1947_v30 = vmul.f32 0.0078125, %v1906_v22 }
 0x648   : > { %v1979_v26 = vadd.f32 1e-05, %v1947_v30 }
 0x649   : > { %v1908_v55 = vpop.xlane.xlu1 %1907 }
 0x64a   : > { %2709 = vrsqrt.f32 %v1979_v26  ;;  %v1948_v23 = vmul.f32 0.0078125, %v1908_v55 }
 0x64c   : > { %v2706_v60 = vpop.eup %2705  ;;  %v1980_v27 = vadd.f32 1e-05, %v1948_v23 }
 0x64d   : > { %v2041_v47 = vmul.f32 %v2706_v60, %v4260_v8  ;;  %v1910_v43 = vpop.xlane.xlu0 %1909 }
 0x64e   : > { %2711 = vrsqrt.f32 %v1980_v27  ;;  %v1949_v10 = vmul.f32 0.0078125, %v1910_v43 }
 0x64f   : > { %v2073_v58 = vmul.f32 %v2041_v47, %v4319_v63 }
 0x650   : > { %v2708_v17 = vpop.eup %2707  ;;  %v1981_v40 = vadd.f32 1e-05, %v1949_v10 }
 0x651   : > { %v2105_v28 = vadd.f32 %v2073_v58, %v4322_v31  ;;  %v2042_v19 = vmul.f32 %v2708_v17, %v4265_v42  ;;  %v1912_v48 = vpop.xlane.xlu1 %1911 }
 0x652   : > { %2713 = vrsqrt.f32 %v1981_v40  ;;  %v1950_v59 = vmul.f32 0.0078125, %v1912_v48 }
 0x653   : > { %2137 = vst [vmem:[%s4330_s24 + $0xa0] sm:$0xff] %v2105_v28  ;;  %v2074_v37 = vmul.f32 %v2042_v19, %v4319_v63 }
 0x654   : > { %v2710_v15 = vpop.eup %2709  ;;  %v1982_v8 = vadd.f32 1e-05, %v1950_v59 }
 0x655   : > { %v2106_v25 = vadd.f32 %v2074_v37, %v4322_v31  ;;  %v2043_v34 = vmul.f32 %v2710_v15, %v4270_v6  ;;  %v1914_v41 = vpop.xlane.xlu0 %1913 }
 0x656   : > { %2715 = vrsqrt.f32 %v1982_v8  ;;  %v1951_v14 = vmul.f32 0.0078125, %v1914_v41 }
 0x657   : > { %2138 = vst [vmem:[%s4330_s24 + $0xa8] sm:$0xff] %v2106_v25  ;;  %v2075_v51 = vmul.f32 %v2043_v34, %v4319_v63 }
 0x658   : > { %v2712_v42 = vpop.eup %2711  ;;  %v1983_v45 = vadd.f32 1e-05, %v1951_v14 }
 0x659   : > { %v2107_v7 = vadd.f32 %v2075_v51, %v4322_v31  ;;  %v2044_v62 = vmul.f32 %v2712_v42, %v4275_v29  ;;  %v1916_v0 = vpop.xlane.xlu1 %1915 }
 0x65a   : > { %2717 = vrsqrt.f32 %v1983_v45  ;;  %v1952_v2 = vmul.f32 0.0078125, %v1916_v0 }
 0x65b   : > { %2139 = vst [vmem:[%s4330_s24 + $0xb0] sm:$0xff] %v2107_v7  ;;  %v2076_v35 = vmul.f32 %v2044_v62, %v4319_v63 }
 0x65c   : > { %v2714_v6 = vpop.eup %2713  ;;  %v1984_v5 = vadd.f32 1e-05, %v1952_v2 }
 0x65d   : > { %v2108_v38 = vadd.f32 %v2076_v35, %v4322_v31  ;;  %v2045_v54 = vmul.f32 %v2714_v6, %v4280_v36  ;;  %v1918_v13 = vpop.xlane.xlu0 %1917 }
 0x65e   : > { %2719 = vrsqrt.f32 %v1984_v5  ;;  %v1953_v18 = vmul.f32 0.0078125, %v1918_v13 }
 0x65f   : > { %2140 = vst [vmem:[%s4330_s24 + $0xb8] sm:$0xff] %v2108_v38  ;;  %v2077_v49 = vmul.f32 %v2045_v54, %v4319_v63 }
 0x660   : > { %v2716_v29 = vpop.eup %2715  ;;  %v1985_v33 = vadd.f32 1e-05, %v1953_v18 }
 0x661   : > { %v2109_v44 = vadd.f32 %v2077_v49, %v4322_v31  ;;  %v2046_v9 = vmul.f32 %v2716_v29, %v4285_v12  ;;  %v1920_v3 = vpop.xlane.xlu1 %1919 }
 0x662   : > { %2721 = vrsqrt.f32 %v1985_v33  ;;  %v1954_v16 = vmul.f32 0.0078125, %v1920_v3 }
 0x663   : > { %2141 = vst [vmem:[%s4330_s24 + $0xc0] sm:$0xff] %v2109_v44  ;;  %v2078_v1 = vmul.f32 %v2046_v9, %v4319_v63 }
 0x664   : > { %v2718_v36 = vpop.eup %2717  ;;  %v1986_v20 = vadd.f32 1e-05, %v1954_v16 }
 0x665   : > { %v2110_v11 = vadd.f32 %v2078_v1, %v4322_v31  ;;  %v2047_v32 = vmul.f32 %v2718_v36, %v4290_v57  ;;  %v1922_v50 = vpop.xlane.xlu0 %1921 }
 0x666   : > { %2723 = vrsqrt.f32 %v1986_v20  ;;  %v1955_v52 = vmul.f32 0.0078125, %v1922_v50 }
 0x667   : > { %2142 = vst [vmem:[%s4330_s24 + $0xc8] sm:$0xff] %v2110_v11  ;;  %v2079_v12 = vmul.f32 %v2047_v32, %v4319_v63 }
 0x668   : > { %v2720_v56 = vpop.eup %2719  ;;  %v1987_v24 = vadd.f32 1e-05, %v1955_v52 }
 0x669   : > { %v2111_v4 = vadd.f32 %v2079_v12, %v4322_v31  ;;  %v2048_v22 = vmul.f32 %v2720_v56, %v4295_v53  ;;  %v1924_v30 = vpop.xlane.xlu1 %1923 }
 0x66a   : > { %2725 = vrsqrt.f32 %v1987_v24  ;;  %v1956_v26 = vmul.f32 0.0078125, %v1924_v30 }
 0x66b   : > { %2143 = vst [vmem:[%s4330_s24 + $0xd0] sm:$0xff] %v2111_v4  ;;  %v2080_v57 = vmul.f32 %v2048_v22, %v4319_v63 }
 0x66c   : > { %v2722_v55 = vpop.eup %2721  ;;  %v1988_v23 = vadd.f32 1e-05, %v1956_v26 }
 0x66d   : > { %v2112_v60 = vadd.f32 %v2080_v57, %v4322_v31  ;;  %v2049_v27 = vmul.f32 %v2722_v55, %v4300_v21 }
 0x66e   : > { %2727 = vrsqrt.f32 %v1988_v23 }
 0x66f   : > { %2144 = vst [vmem:[%s4330_s24 + $0xd8] sm:$0xff] %v2112_v60  ;;  %v2081_v53 = vmul.f32 %v2049_v27, %v4319_v63 }
 0x670   : > { %v2724_v47 = vpop.eup %2723 }
 0x671   : > { %v2113_v43 = vadd.f32 %v2081_v53, %v4322_v31  ;;  %v2050_v10 = vmul.f32 %v2724_v47, %v4305_v61 }
 0x673   : > { %2145 = vst [vmem:[%s4330_s24 + $0xe0] sm:$0xff] %v2113_v43  ;;  %v2082_v58 = vmul.f32 %v2050_v10, %v4319_v63 }
 0x674   : > { %v2726_v17 = vpop.eup %2725 }
 0x675   : > { %v2114_v21 = vadd.f32 %v2082_v58, %v4322_v31  ;;  %v2051_v40 = vmul.f32 %v2726_v17, %v4310_v39 }
 0x677   : > { %2146 = vst [vmem:[%s4330_s24 + $0xe8] sm:$0xff] %v2114_v21  ;;  %v2083_v28 = vmul.f32 %v2051_v40, %v4319_v63 }
 0x678   : > { %v2728_v19 = vpop.eup %2727 }
 0x679   : > { %v2115_v48 = vadd.f32 %v2083_v28, %v4322_v31  ;;  %v2052_v59 = vmul.f32 %v2728_v19, %v4315_v46 }
 0x67b   : > { %2147 = vst [vmem:[%s4330_s24 + $0xf0] sm:$0xff] %v2115_v48  ;;  %v2084_v61 = vmul.f32 %v2052_v59, %v4319_v63 }
 0x67d   : > { %v2116_v39 = vadd.f32 %v2084_v61, %v4322_v31 }
 0x67f   : > { %2148 = vst [vmem:[%s4330_s24 + $0xf8] sm:$0xff] %v2116_v39 }
 0x680   : > { %2884 = shalt.err (!%p2881_p13)
}
 0x681   : > { %s2885_s29 = scalar_lea.hbm %s4458_s7, 4096  ;;  %s2889_s10 = scalar_lea.hbm %s4511_s5, 8192 }
 0x682   : > { %p2886_p0 = scmp.ne.s32.totalorder %s4458_s7, %s2885_s29  ;;  %p2890_p1 = scmp.lt.u32.totalorder %s4458_s7, %s4511_s5 }
 0x683   : > { %p2891_p2 = scmp.lt.u32.totalorder %s2889_s10, %s2885_s29  ;;  %p2893_p8 = scmp.lt.u32.totalorder %s2885_s29, %s4458_s7 }
 0x684   : > { %p2887_p5 = pnand %p2886_p0, %p3139_p6 }
 0x685   : > { %p2892_p4 = por %p2891_p2, %p2890_p1 }
 0x686   : > { %p2888_p11 = pneg %p2887_p5 }
 0x687   : > { %p2894_p10 = por %p2893_p8, %p2892_p4 }
 0x689   : > { %p2895_p12 = pnand %p2894_p10, %p2888_p11 }
 0x68b   : > { %2898 = shalt.err (!%p2895_p12)
}
 0x68c   : > { %s2959_s26 = smov 128   ;;  %s2960_s17 = smov 8  }
 0x68d   : > { %2492 = dma.vmem_to_hbm [thread:$0]  (%p3139_p6), %s4460_s16, 4096, %s4458_s7, %s2150_s6, %s2959_s26, %s2959_s26, %s2960_s17  }
 0x68e PF: > { %s2178_s13 = sand.u32 1, %s2933_s18   ;;  %p4529_p3 = scmp.ne.s32.totalorder %s4516_s25, 0 }
 0x68f   : > { %p4530_p7 = scmp.ge.s32.totalorder %s2945_s21, 2  ;;  %s2179_s11 = scalar_lea.sflag [#allocation4], %s2178_s13 }
 0x691   : > { %p2512_p9 = pnand %p4530_p7, %p4529_p3 }
 0x693   : > { %2928 = dma.done.wait (!%p2512_p9), %s2179_s11, 4096  }
 0x694   : > { %2930 = vsyncadd (!%p2512_p9), %s2179_s11, 4294963200  ;;  %p20_p13 = scmp.ge.s32.totalorder %s3129_s12, 4   ;;  %s4531_s18 = smov %s2937_s19 }
 0x695   : > { %s4532_s19 = smov %s2941_s20  ;;  %s4533_s20 = smov %s3145_s30 }
 0x696   : > { %s4534_s21 = smov %s3129_s12  ;;  %22 = sbr.rel (!%p20_p13) target bundleno = 7 (0x7), region = 102 }
 0x69d   :  { %2184 = vsyncpa [#allocation3], 1 }
 0x69e   :  { %2186 = vsyncpa [#allocation3 + $0x1], 1 }
 0x69f   :  { %2187 = vsyncpa [#allocation6], 1 }
 0x6a0   :  { %2188 = vsyncpa [#allocation9], 1 }
 0x6a1   :  { %2189 = vsyncpa [#allocation4], 1 }
 0x6a2   :  { %2191 = vsyncpa [#allocation4 + $0x1], 1 }

</bundles_post_ra>
